<compile_context>
chip_gen: v7x
topology: tpu7x:2x2x1
jax: 0.10.0
libtpu: 0.0.40
codegen_flags: <defaults>
</compile_context>

<pallas_src>
import math
import functools

import jax
import jax.numpy as jnp
import numpy as np
from jax import lax
from jax.experimental import pallas as pl
from jax.experimental.pallas import tpu as pltpu

HIDDEN = 512              # fixed by the module definition
LN_EPS = 1e-5             # nn.LayerNorm default eps
LOG_2PI = math.log(2.0 * math.pi)
LANE = 128                # TPU lane width


def _round_up(x, m):
    return ((x + m - 1) // m) * m


def _mish(x):
    # Mish(x) = x * tanh(softplus(x)) = x * t*(t+2) / (t*(t+2) + 2), t = exp(x).
    # Clamping the exp argument at 20 keeps t finite; for x >= 20 the ratio is
    # 1.0 in f32 so the clamped formula equals x exactly (torch's softplus
    # threshold gives the same limit).  EUP cost: exp + rcp (2 ops) instead of
    # exp + log + tanh (3 ops).
    t = jnp.exp(jnp.minimum(x, 20.0))
    num = t * (t + 2.0)
    return x * (num / (num + 2.0))


def _normed_linear(x, w, b, g, beta):
    """Linear -> LayerNorm -> Mish  (NormedLinear.forward, dropout=0).

    Matmul operands are cast to the (possibly bf16) weight dtype; accumulation
    and all element-wise / LayerNorm math stay in f32.  LayerNorm stats use a
    one-pass formulation (E[x^2] - mean^2) so the two 512-wide XLU reductions
    are independent instead of serialized.
    """
    h = jnp.dot(x.astype(w.dtype), w, preferred_element_type=jnp.float32) + b
    inv_n = 1.0 / h.shape[-1]
    mean = jnp.sum(h, axis=-1, keepdims=True) * inv_n
    ex2 = jnp.sum(h * h, axis=-1, keepdims=True) * inv_n
    var = jnp.maximum(ex2 - mean * mean, 0.0)
    hn = (h - mean) * lax.rsqrt(var + LN_EPS)
    hn = hn * g + beta
    return _mish(hn)


def actor_kernel(latent_ref, eps_ref,
                 w1_ref, b1_ref, g1_ref, be1_ref,
                 w2_ref, b2_ref, g2_ref, be2_ref,
                 w3_ref, b3_ref,
                 out_ref,
                 *, act_dim, act_limit, log_std_min, log_std_max):
    x = latent_ref[...]

    h1 = _normed_linear(x, w1_ref[...], b1_ref[...], g1_ref[...], be1_ref[...])
    h2 = _normed_linear(h1, w2_ref[...], b2_ref[...], g2_ref[...], be2_ref[...])

    # Fused head: Linear(512, 2*act_dim) padded (at param-prep time) to two
    # 128-lane blocks ([mu | 0...][log_std_raw | 0...]) so both narrow slices
    # below start at lane-block-aligned offsets (0 and a_pad).
    head = jnp.dot(h2.astype(w3_ref.dtype), w3_ref[...],
                   preferred_element_type=jnp.float32) + b3_ref[...]
    a_pad = head.shape[-1] // 2
    mu = head[:, :act_dim]                         # (tile_b, act_dim)
    ls_raw = head[:, a_pad:a_pad + act_dim]        # (tile_b, act_dim)

    log_std = log_std_min + 0.5 * (jnp.tanh(ls_raw) + 1.0) * (log_std_max - log_std_min)
    # TODO(synk): torch's host-side debug `print(f'Actor log std: ...')` omitted.

    # eps arrives at natural (tile_b, act_dim) width (no HBM lane padding).
    # TODO(synk): torch samples eps with randn_like inside forward(); it is
    # passed in explicitly here for determinism / testability.
    eps = eps_ref[...]
    pi = mu + eps * jnp.exp(log_std)

    log_pi = jnp.sum(-0.5 * (eps * eps + 2.0 * log_std + LOG_2PI),
                     axis=-1, keepdims=True)

    mu_t = jnp.tanh(mu)
    pi_t = jnp.tanh(pi)
    corr = jnp.log(jnp.maximum(1.0 - pi_t * pi_t, 0.0) + 1e-6)
    log_pi = log_pi - jnp.sum(corr, axis=-1, keepdims=True)

    # Packed output (block is lane-dense 4*128 wide -> unmasked HBM writeback).
    # Each quantity is written at a 128-aligned lane offset; unwritten padded
    # lanes carry garbage and are sliced away by the wrapper.
    out_ref[:, 0 * a_pad:0 * a_pad + act_dim] = mu_t * act_limit
    out_ref[:, 1 * a_pad:1 * a_pad + act_dim] = pi_t * act_limit
    out_ref[:, 2 * a_pad:2 * a_pad + act_dim] = log_std
    out_ref[:, 3 * a_pad:3 * a_pad + 1] = log_pi


def make_actor_params(key, latent_dim, act_dim):
    """Deterministic init matching Actor.__init__ shapes / init scheme."""
    k1, k2 = jax.random.split(key, 2)

    def linear_init(k, fan_in, fan_out):
        # PyTorch nn.Linear default: U(-1/sqrt(fan_in), 1/sqrt(fan_in))
        kw, kb = jax.random.split(k)
        bound = 1.0 / math.sqrt(fan_in)
        w = jax.random.uniform(kw, (fan_in, fan_out), jnp.float32, -bound, bound)
        b = jax.random.uniform(kb, (1, fan_out), jnp.float32, -bound, bound)
        return w, b

    w1, b1 = linear_init(k1, latent_dim, HIDDEN)
    w2, b2 = linear_init(k2, HIDDEN, HIDDEN)
    g1, be1 = jnp.ones((1, HIDDEN), jnp.float32), jnp.zeros((1, HIDDEN), jnp.float32)
    g2, be2 = jnp.ones((1, HIDDEN), jnp.float32), jnp.zeros((1, HIDDEN), jnp.float32)
    # final layer zero-initialised as in Actor.__init__ (nn.init.zeros_)
    w3m = jnp.zeros((HIDDEN, act_dim), jnp.float32)
    b3m = jnp.zeros((1, act_dim), jnp.float32)
    w3s = jnp.zeros((HIDDEN, act_dim), jnp.float32)
    b3s = jnp.zeros((1, act_dim), jnp.float32)
    return (w1, b1, g1, be1, w2, b2, g2, be2, w3m, b3m, w3s, b3s)


def prepare_actor_params(params, *, matmul_dtype=jnp.bfloat16):
    """One-time re-layout: cast matmul weights, fuse+pad the head to 2*128 lanes."""
    (w1, b1, g1, be1, w2, b2, g2, be2, w3m, b3m, w3s, b3s) = params
    act_dim = w3m.shape[1]
    a_pad = _round_up(act_dim, LANE)
    md = jnp.dtype(matmul_dtype)

    w3 = jnp.zeros((w3m.shape[0], 2 * a_pad), jnp.float32)
    w3 = w3.at[:, :act_dim].set(w3m).at[:, a_pad:a_pad + act_dim].set(w3s)
    b3 = jnp.zeros((1, 2 * a_pad), jnp.float32)
    b3 = b3.at[:, :act_dim].set(b3m).at[:, a_pad:a_pad + act_dim].set(b3s)

    # TODO(synk): padding latent_dim/w1-rows to 128 (MXU-native K) was judged
    # not worth the per-call latent pad copy it would require; skipped.
    return (w1.astype(md), b1, g1, be1,
            w2.astype(md), b2, g2, be2,
            w3.astype(md), b3)


def actor_forward(latent, eps, prepared, *, act_limit,
                  log_std_min=-5.0, log_std_max=2.0, tile_b=None):
    (w1, b1, g1, be1, w2, b2, g2, be2, w3, b3) = prepared
    B, latent_dim = latent.shape
    act_dim = eps.shape[-1]
    a_pad = w3.shape[1] // 2
    out_w = 4 * a_pad

    # Large batch tiles keep per-grid-step overhead (~0.35 us) negligible; for
    # B > 64 ensure >= 2 grid steps so v7x's two TensorCores both get work.
    if tile_b is None:
        tile_b = min(1024, _round_up(B, 8))
        if B > 64 and pl.cdiv(B, tile_b) < 2:
            tile_b = max(8, _round_up(pl.cdiv(B, 2), 8))
    tile_b = max(8, _round_up(tile_b, 8))

    grid = (pl.cdiv(B, tile_b),)

    kernel = functools.partial(
        actor_kernel, act_dim=act_dim, act_limit=float(act_limit),
        log_std_min=float(log_std_min), log_std_max=float(log_std_max))

    def const(shape):
        # Weights / norm params: identical block for every grid step (the
        # pipeliner does not re-fetch an unchanged block).
        return pl.BlockSpec(shape, lambda i: (0, 0))

    packed = pl.pallas_call(
        kernel,
        grid=grid,
        in_specs=[
            pl.BlockSpec((tile_b, latent_dim), lambda i: (i, 0)),
            pl.BlockSpec((tile_b, act_dim), lambda i: (i, 0)),
            const((latent_dim, HIDDEN)), const((1, HIDDEN)), const((1, HIDDEN)), const((1, HIDDEN)),
            const((HIDDEN, HIDDEN)), const((1, HIDDEN)), const((1, HIDDEN)), const((1, HIDDEN)),
            const((HIDDEN, 2 * a_pad)), const((1, 2 * a_pad)),
        ],
        out_specs=pl.BlockSpec((tile_b, out_w), lambda i: (i, 0)),
        out_shape=jax.ShapeDtypeStruct((B, out_w), jnp.float32),
        compiler_params=pltpu.CompilerParams(
            dimension_semantics=("parallel",),
            vmem_limit_bytes=48 * 1024 * 1024),
    )(latent, eps, w1, b1, g1, be1, w2, b2, g2, be2, w3, b3)

    mu = packed[:, 0:act_dim]
    pi = packed[:, a_pad:a_pad + act_dim]
    log_std = packed[:, 2 * a_pad:2 * a_pad + act_dim]
    log_pi = packed[:, 3 * a_pad:3 * a_pad + 1]
    return mu, pi, log_pi, log_std


def actor_forward_ref(latent, eps, params, *, act_limit,
                      log_std_min=-5.0, log_std_max=2.0, matmul_dtype=jnp.float32):
    """Pure-JAX reference (torch-style two-pass LayerNorm) for correctness checks."""
    (w1, b1, g1, be1, w2, b2, g2, be2, w3m, b3m, w3s, b3s) = params
    md = jnp.dtype(matmul_dtype)

    def mm(x, w):
        return jnp.dot(x.astype(md), w.astype(md), preferred_element_type=jnp.float32)

    def ln_mish(h, g, beta):
        mean = jnp.mean(h, axis=-1, keepdims=True)
        var = jnp.mean(jnp.square(h - mean), axis=-1, keepdims=True)
        hn = (h - mean) * lax.rsqrt(var + LN_EPS) * g + beta
        return hn * jnp.tanh(jax.nn.softplus(hn))

    h1 = ln_mish(mm(latent, w1) + b1, g1, be1)
    h2 = ln_mish(mm(h1, w2) + b2, g2, be2)
    mu = mm(h2, w3m) + b3m
    ls_raw = mm(h2, w3s) + b3s
    log_std = log_std_min + 0.5 * (jnp.tanh(ls_raw) + 1.0) * (log_std_max - log_std_min)
    pi = mu + eps * jnp.exp(log_std)
    log_pi = jnp.sum(-0.5 * (eps ** 2 + 2.0 * log_std + LOG_2PI),
                     axis=-1, keepdims=True)
    mu_t, pi_t = jnp.tanh(mu), jnp.tanh(pi)
    log_pi = log_pi - jnp.sum(jnp.log(jnp.maximum(1.0 - pi_t ** 2, 0.0) + 1e-6),
                              axis=-1, keepdims=True)
    return mu_t * act_limit, pi_t * act_limit, log_pi, log_std


if __name__ == "__main__":
    latent_dim = 32
    act_dim = 8
    act_limit = 1.0
    B = 16

    key = jax.random.PRNGKey(0)
    k_params, k_latent, k_eps, k_w3m, k_w3s = jax.random.split(key, 5)

    # Module-faithful params (zero-init head, as in Actor.__init__).
    params = make_actor_params(k_params, latent_dim, act_dim)
    # Variant with a non-zero head so the fused/padded head matmul, slicing and
    # output packing are exercised numerically (test-only; module init is zero).
    params_rand = list(params)
    params_rand[8] = 0.03 * jax.random.normal(k_w3m, (HIDDEN, act_dim), jnp.float32)
    params_rand[10] = 0.03 * jax.random.normal(k_w3s, (HIDDEN, act_dim), jnp.float32)
    params_rand = tuple(params_rand)

    latent = jax.random.normal(k_latent, (B, latent_dim), jnp.float32)
    # torch.randn_like(mu) -> sampled outside the kernel for determinism
    eps = jax.random.normal(k_eps, (B, act_dim), jnp.float32)

    def check(p, lat, ep, tile_b=None, tag=""):
        prep = prepare_actor_params(p, matmul_dtype=jnp.bfloat16)
        outs = actor_forward(lat, ep, prep, act_limit=act_limit, tile_b=tile_b)
        jax.block_until_ready(outs)
        refs = actor_forward_ref(lat, ep, p, act_limit=act_limit,
                                 matmul_dtype=jnp.bfloat16)
        for name, o, r in zip(("mu", "pi", "log_pi", "log_std"), outs, refs):
            np.testing.assert_allclose(np.asarray(o), np.asarray(r),
                                       atol=2e-3, rtol=2e-3,
                                       err_msg=f"{tag}:{name}")

    check(params, latent, eps, tag="zero-head")                    # module init
    check(params_rand, latent, eps, tag="rand-head")               # non-trivial head
    check(params_rand, latent, eps, tile_b=8, tag="multi-step")    # >1 grid step
    check(params_rand, latent[:13], eps[:13], tag="partial-block") # B % tile_b != 0

    print("KERNEL_OK")
</pallas_src>

<mosaic_0001>
module attributes {stable_mosaic.version = 11 : i64} {
  func.func @actor_kernel(%arg0: i32, %arg1: memref<16x32xf32, #tpu.memory_space<vmem>>, %arg2: memref<16x8xf32, #tpu.memory_space<vmem>>, %arg3: memref<32x512xbf16, #tpu.memory_space<vmem>>, %arg4: memref<1x512xf32, #tpu.memory_space<vmem>>, %arg5: memref<1x512xf32, #tpu.memory_space<vmem>>, %arg6: memref<1x512xf32, #tpu.memory_space<vmem>>, %arg7: memref<512x512xbf16, #tpu.memory_space<vmem>>, %arg8: memref<1x512xf32, #tpu.memory_space<vmem>>, %arg9: memref<1x512xf32, #tpu.memory_space<vmem>>, %arg10: memref<1x512xf32, #tpu.memory_space<vmem>>, %arg11: memref<512x256xbf16, #tpu.memory_space<vmem>>, %arg12: memref<1x256xf32, #tpu.memory_space<vmem>>, %arg13: memref<16x512xf32, #tpu.memory_space<vmem>>) attributes {dimension_semantics = [#tpu.dimension_semantics<parallel>], iteration_bounds = array<i64: 1>, scalar_prefetch = 0 : i64, scratch_operands = 0 : i64, tpu.core_type = #tpu.core_type<tc>, window_params = [{transform_indices = @transform_0, window_bounds = array<i64: 16, 32>}, {transform_indices = @transform_1, window_bounds = array<i64: 16, 8>}, {pipeline_mode = #tpu.pipeline_mode<synchronous>, transform_indices = @transform_2, window_bounds = array<i64: 32, 512>}, {pipeline_mode = #tpu.pipeline_mode<synchronous>, transform_indices = @transform_3, window_bounds = array<i64: 1, 512>}, {pipeline_mode = #tpu.pipeline_mode<synchronous>, transform_indices = @transform_4, window_bounds = array<i64: 1, 512>}, {pipeline_mode = #tpu.pipeline_mode<synchronous>, transform_indices = @transform_5, window_bounds = array<i64: 1, 512>}, {pipeline_mode = #tpu.pipeline_mode<synchronous>, transform_indices = @transform_6, window_bounds = array<i64: 512, 512>}, {pipeline_mode = #tpu.pipeline_mode<synchronous>, transform_indices = @transform_7, window_bounds = array<i64: 1, 512>}, {pipeline_mode = #tpu.pipeline_mode<synchronous>, transform_indices = @transform_8, window_bounds = array<i64: 1, 512>}, {pipeline_mode = #tpu.pipeline_mode<synchronous>, transform_indices = @transform_9, window_bounds = array<i64: 1, 512>}, {pipeline_mode = #tpu.pipeline_mode<synchronous>, transform_indices = @transform_10, window_bounds = array<i64: 512, 256>}, {pipeline_mode = #tpu.pipeline_mode<synchronous>, transform_indices = @transform_11, window_bounds = array<i64: 1, 256>}, {transform_indices = @transform_12, window_bounds = array<i64: 16, 512>}]} {
    %c0 = arith.constant 0 : index
    %c0_0 = arith.constant 0 : index
    %0 = vector.load %arg1[%c0, %c0_0] : memref<16x32xf32, #tpu.memory_space<vmem>>, vector<16x32xf32>
    %c0_1 = arith.constant 0 : index
    %c0_2 = arith.constant 0 : index
    %1 = vector.load %arg3[%c0_1, %c0_2] : memref<32x512xbf16, #tpu.memory_space<vmem>>, vector<32x512xbf16>
    %c0_3 = arith.constant 0 : index
    %c0_4 = arith.constant 0 : index
    %2 = vector.load %arg4[%c0_3, %c0_4] : memref<1x512xf32, #tpu.memory_space<vmem>>, vector<1x512xf32>
    %c0_5 = arith.constant 0 : index
    %c0_6 = arith.constant 0 : index
    %3 = vector.load %arg5[%c0_5, %c0_6] : memref<1x512xf32, #tpu.memory_space<vmem>>, vector<1x512xf32>
    %c0_7 = arith.constant 0 : index
    %c0_8 = arith.constant 0 : index
    %4 = vector.load %arg6[%c0_7, %c0_8] : memref<1x512xf32, #tpu.memory_space<vmem>>, vector<1x512xf32>
    %5 = arith.truncf %0 : vector<16x32xf32> to vector<16x32xbf16>
    %cst = arith.constant dense<0.000000e+00> : vector<16x512xf32>
    %6 = tpu.matmul %5, %1, %cst {dimension_numbers = #tpu.dot_dimension_numbers<[1], [0], [0], [1], [0, 0, 1, 1], [], []>} : vector<16x32xbf16>, vector<32x512xbf16>, vector<16x512xf32> -> vector<16x512xf32>
    %7 = vector.broadcast %2 : vector<1x512xf32> to vector<16x512xf32>
    %8 = arith.addf %6, %7 : vector<16x512xf32>
    %cst_9 = arith.constant dense<0.000000e+00> : vector<16xf32>
    %9 = vector.multi_reduction <add>, %8, %cst_9 [1] : vector<16x512xf32> to vector<16xf32>
    %10 = vector.shape_cast %9 : vector<16xf32> to vector<16x1xf32>
    %cst_10 = arith.constant 0.001953125 : f32
    %11 = vector.broadcast %cst_10 : f32 to vector<16x1xf32>
    %12 = arith.mulf %10, %11 : vector<16x1xf32>
    %13 = arith.mulf %8, %8 : vector<16x512xf32>
    %cst_11 = arith.constant dense<0.000000e+00> : vector<16xf32>
    %14 = vector.multi_reduction <add>, %13, %cst_11 [1] : vector<16x512xf32> to vector<16xf32>
    %15 = vector.shape_cast %14 : vector<16xf32> to vector<16x1xf32>
    %cst_12 = arith.constant 0.001953125 : f32
    %16 = vector.broadcast %cst_12 : f32 to vector<16x1xf32>
    %17 = arith.mulf %15, %16 : vector<16x1xf32>
    %18 = arith.mulf %12, %12 : vector<16x1xf32>
    %19 = arith.subf %17, %18 : vector<16x1xf32>
    %cst_13 = arith.constant 0.000000e+00 : f32
    %20 = vector.broadcast %cst_13 : f32 to vector<16x1xf32>
    %21 = arith.maximumf %19, %20 : vector<16x1xf32>
    %22 = vector.broadcast %12 : vector<16x1xf32> to vector<16x512xf32>
    %23 = arith.subf %8, %22 : vector<16x512xf32>
    %cst_14 = arith.constant 9.99999974E-6 : f32
    %24 = vector.broadcast %cst_14 : f32 to vector<16x1xf32>
    %25 = arith.addf %21, %24 : vector<16x1xf32>
    %26 = math.rsqrt %25 : vector<16x1xf32>
    %27 = vector.broadcast %26 : vector<16x1xf32> to vector<16x512xf32>
    %28 = arith.mulf %23, %27 : vector<16x512xf32>
    %29 = vector.broadcast %3 : vector<1x512xf32> to vector<16x512xf32>
    %30 = arith.mulf %28, %29 : vector<16x512xf32>
    %31 = vector.broadcast %4 : vector<1x512xf32> to vector<16x512xf32>
    %32 = arith.addf %30, %31 : vector<16x512xf32>
    %cst_15 = arith.constant 2.000000e+01 : f32
    %33 = vector.broadcast %cst_15 : f32 to vector<16x512xf32>
    %34 = arith.minimumf %32, %33 : vector<16x512xf32>
    %35 = math.exp %34 : vector<16x512xf32>
    %cst_16 = arith.constant 2.000000e+00 : f32
    %36 = vector.broadcast %cst_16 : f32 to vector<16x512xf32>
    %37 = arith.addf %35, %36 : vector<16x512xf32>
    %38 = arith.mulf %35, %37 : vector<16x512xf32>
    %cst_17 = arith.constant 2.000000e+00 : f32
    %39 = vector.broadcast %cst_17 : f32 to vector<16x512xf32>
    %40 = arith.addf %38, %39 : vector<16x512xf32>
    %41 = arith.divf %38, %40 : vector<16x512xf32>
    %42 = arith.mulf %32, %41 : vector<16x512xf32>
    %c0_18 = arith.constant 0 : index
    %c0_19 = arith.constant 0 : index
    %43 = vector.load %arg7[%c0_18, %c0_19] : memref<512x512xbf16, #tpu.memory_space<vmem>>, vector<512x512xbf16>
    %c0_20 = arith.constant 0 : index
    %c0_21 = arith.constant 0 : index
    %44 = vector.load %arg8[%c0_20, %c0_21] : memref<1x512xf32, #tpu.memory_space<vmem>>, vector<1x512xf32>
    %c0_22 = arith.constant 0 : index
    %c0_23 = arith.constant 0 : index
    %45 = vector.load %arg9[%c0_22, %c0_23] : memref<1x512xf32, #tpu.memory_space<vmem>>, vector<1x512xf32>
    %c0_24 = arith.constant 0 : index
    %c0_25 = arith.constant 0 : index
    %46 = vector.load %arg10[%c0_24, %c0_25] : memref<1x512xf32, #tpu.memory_space<vmem>>, vector<1x512xf32>
    %47 = arith.truncf %42 : vector<16x512xf32> to vector<16x512xbf16>
    %cst_26 = arith.constant dense<0.000000e+00> : vector<16x512xf32>
    %48 = tpu.matmul %47, %43, %cst_26 {dimension_numbers = #tpu.dot_dimension_numbers<[1], [0], [0], [1], [0, 0, 1, 1], [], []>} : vector<16x512xbf16>, vector<512x512xbf16>, vector<16x512xf32> -> vector<16x512xf32>
    %49 = vector.broadcast %44 : vector<1x512xf32> to vector<16x512xf32>
    %50 = arith.addf %48, %49 : vector<16x512xf32>
    %cst_27 = arith.constant dense<0.000000e+00> : vector<16xf32>
    %51 = vector.multi_reduction <add>, %50, %cst_27 [1] : vector<16x512xf32> to vector<16xf32>
    %52 = vector.shape_cast %51 : vector<16xf32> to vector<16x1xf32>
    %cst_28 = arith.constant 0.001953125 : f32
    %53 = vector.broadcast %cst_28 : f32 to vector<16x1xf32>
    %54 = arith.mulf %52, %53 : vector<16x1xf32>
    %55 = arith.mulf %50, %50 : vector<16x512xf32>
    %cst_29 = arith.constant dense<0.000000e+00> : vector<16xf32>
    %56 = vector.multi_reduction <add>, %55, %cst_29 [1] : vector<16x512xf32> to vector<16xf32>
    %57 = vector.shape_cast %56 : vector<16xf32> to vector<16x1xf32>
    %cst_30 = arith.constant 0.001953125 : f32
    %58 = vector.broadcast %cst_30 : f32 to vector<16x1xf32>
    %59 = arith.mulf %57, %58 : vector<16x1xf32>
    %60 = arith.mulf %54, %54 : vector<16x1xf32>
    %61 = arith.subf %59, %60 : vector<16x1xf32>
    %cst_31 = arith.constant 0.000000e+00 : f32
    %62 = vector.broadcast %cst_31 : f32 to vector<16x1xf32>
    %63 = arith.maximumf %61, %62 : vector<16x1xf32>
    %64 = vector.broadcast %54 : vector<16x1xf32> to vector<16x512xf32>
    %65 = arith.subf %50, %64 : vector<16x512xf32>
    %cst_32 = arith.constant 9.99999974E-6 : f32
    %66 = vector.broadcast %cst_32 : f32 to vector<16x1xf32>
    %67 = arith.addf %63, %66 : vector<16x1xf32>
    %68 = math.rsqrt %67 : vector<16x1xf32>
    %69 = vector.broadcast %68 : vector<16x1xf32> to vector<16x512xf32>
    %70 = arith.mulf %65, %69 : vector<16x512xf32>
    %71 = vector.broadcast %45 : vector<1x512xf32> to vector<16x512xf32>
    %72 = arith.mulf %70, %71 : vector<16x512xf32>
    %73 = vector.broadcast %46 : vector<1x512xf32> to vector<16x512xf32>
    %74 = arith.addf %72, %73 : vector<16x512xf32>
    %cst_33 = arith.constant 2.000000e+01 : f32
    %75 = vector.broadcast %cst_33 : f32 to vector<16x512xf32>
    %76 = arith.minimumf %74, %75 : vector<16x512xf32>
    %77 = math.exp %76 : vector<16x512xf32>
    %cst_34 = arith.constant 2.000000e+00 : f32
    %78 = vector.broadcast %cst_34 : f32 to vector<16x512xf32>
    %79 = arith.addf %77, %78 : vector<16x512xf32>
    %80 = arith.mulf %77, %79 : vector<16x512xf32>
    %cst_35 = arith.constant 2.000000e+00 : f32
    %81 = vector.broadcast %cst_35 : f32 to vector<16x512xf32>
    %82 = arith.addf %80, %81 : vector<16x512xf32>
    %83 = arith.divf %80, %82 : vector<16x512xf32>
    %84 = arith.mulf %74, %83 : vector<16x512xf32>
    %85 = arith.truncf %84 : vector<16x512xf32> to vector<16x512xbf16>
    %c0_36 = arith.constant 0 : index
    %c0_37 = arith.constant 0 : index
    %86 = vector.load %arg11[%c0_36, %c0_37] : memref<512x256xbf16, #tpu.memory_space<vmem>>, vector<512x256xbf16>
    %cst_38 = arith.constant dense<0.000000e+00> : vector<16x256xf32>
    %87 = tpu.matmul %85, %86, %cst_38 {dimension_numbers = #tpu.dot_dimension_numbers<[1], [0], [0], [1], [0, 0, 1, 1], [], []>} : vector<16x512xbf16>, vector<512x256xbf16>, vector<16x256xf32> -> vector<16x256xf32>
    %c0_39 = arith.constant 0 : index
    %c0_40 = arith.constant 0 : index
    %88 = vector.load %arg12[%c0_39, %c0_40] : memref<1x256xf32, #tpu.memory_space<vmem>>, vector<1x256xf32>
    %89 = vector.broadcast %88 : vector<1x256xf32> to vector<16x256xf32>
    %90 = arith.addf %87, %89 : vector<16x256xf32>
    %91 = vector.extract_strided_slice %90 {offsets = [0, 0], sizes = [16, 8], strides = [1, 1]} : vector<16x256xf32> to vector<16x8xf32>
    %92 = vector.extract_strided_slice %90 {offsets = [0, 128], sizes = [16, 8], strides = [1, 1]} : vector<16x256xf32> to vector<16x8xf32>
    %93 = math.tanh %92 : vector<16x8xf32>
    %cst_41 = arith.constant 1.000000e+00 : f32
    %94 = vector.broadcast %cst_41 : f32 to vector<16x8xf32>
    %95 = arith.addf %93, %94 : vector<16x8xf32>
    %cst_42 = arith.constant 5.000000e-01 : f32
    %96 = vector.broadcast %cst_42 : f32 to vector<16x8xf32>
    %97 = arith.mulf %96, %95 : vector<16x8xf32>
    %cst_43 = arith.constant 7.000000e+00 : f32
    %98 = vector.broadcast %cst_43 : f32 to vector<16x8xf32>
    %99 = arith.mulf %97, %98 : vector<16x8xf32>
    %cst_44 = arith.constant -5.000000e+00 : f32
    %100 = vector.broadcast %cst_44 : f32 to vector<16x8xf32>
    %101 = arith.addf %100, %99 : vector<16x8xf32>
    %c0_45 = arith.constant 0 : index
    %c0_46 = arith.constant 0 : index
    %102 = vector.load %arg2[%c0_45, %c0_46] : memref<16x8xf32, #tpu.memory_space<vmem>>, vector<16x8xf32>
    %103 = math.exp %101 : vector<16x8xf32>
    %104 = arith.mulf %102, %103 : vector<16x8xf32>
    %105 = arith.addf %91, %104 : vector<16x8xf32>
    %106 = arith.mulf %102, %102 : vector<16x8xf32>
    %cst_47 = arith.constant 2.000000e+00 : f32
    %107 = vector.broadcast %cst_47 : f32 to vector<16x8xf32>
    %108 = arith.mulf %107, %101 : vector<16x8xf32>
    %109 = arith.addf %106, %108 : vector<16x8xf32>
    %cst_48 = arith.constant 1.83787704 : f32
    %110 = vector.broadcast %cst_48 : f32 to vector<16x8xf32>
    %111 = arith.addf %109, %110 : vector<16x8xf32>
    %cst_49 = arith.constant -5.000000e-01 : f32
    %112 = vector.broadcast %cst_49 : f32 to vector<16x8xf32>
    %113 = arith.mulf %112, %111 : vector<16x8xf32>
    %cst_50 = arith.constant dense<0.000000e+00> : vector<16xf32>
    %114 = vector.multi_reduction <add>, %113, %cst_50 [1] : vector<16x8xf32> to vector<16xf32>
    %115 = vector.shape_cast %114 : vector<16xf32> to vector<16x1xf32>
    %116 = math.tanh %91 : vector<16x8xf32>
    %117 = math.tanh %105 : vector<16x8xf32>
    %118 = arith.mulf %117, %117 : vector<16x8xf32>
    %cst_51 = arith.constant 1.000000e+00 : f32
    %119 = vector.broadcast %cst_51 : f32 to vector<16x8xf32>
    %120 = arith.subf %119, %118 : vector<16x8xf32>
    %cst_52 = arith.constant 0.000000e+00 : f32
    %121 = vector.broadcast %cst_52 : f32 to vector<16x8xf32>
    %122 = arith.maximumf %120, %121 : vector<16x8xf32>
    %cst_53 = arith.constant 9.99999997E-7 : f32
    %123 = vector.broadcast %cst_53 : f32 to vector<16x8xf32>
    %124 = arith.addf %122, %123 : vector<16x8xf32>
    %125 = math.log %124 : vector<16x8xf32>
    %cst_54 = arith.constant dense<0.000000e+00> : vector<16xf32>
    %126 = vector.multi_reduction <add>, %125, %cst_54 [1] : vector<16x8xf32> to vector<16xf32>
    %127 = vector.shape_cast %126 : vector<16xf32> to vector<16x1xf32>
    %128 = arith.subf %115, %127 : vector<16x1xf32>
    %cst_55 = arith.constant 1.000000e+00 : f32
    %129 = vector.broadcast %cst_55 : f32 to vector<16x8xf32>
    %130 = arith.mulf %116, %129 : vector<16x8xf32>
    %c0_56 = arith.constant 0 : index
    %c0_57 = arith.constant 0 : index
    %131 = vector.load %arg13[%c0_56, %c0_57] : memref<16x512xf32, #tpu.memory_space<vmem>>, vector<16x8xf32>
    tpu.vector_store %arg13[%c0_56, %c0_57], %130 {strides = array<i32>} : memref<16x512xf32, #tpu.memory_space<vmem>>, vector<16x8xf32>,
    %cst_58 = arith.constant 1.000000e+00 : f32
    %132 = vector.broadcast %cst_58 : f32 to vector<16x8xf32>
    %133 = arith.mulf %117, %132 : vector<16x8xf32>
    %c0_59 = arith.constant 0 : index
    %c128 = arith.constant 128 : index
    %134 = vector.load %arg13[%c0_59, %c128] : memref<16x512xf32, #tpu.memory_space<vmem>>, vector<16x8xf32>
    tpu.vector_store %arg13[%c0_59, %c128], %133 {strides = array<i32>} : memref<16x512xf32, #tpu.memory_space<vmem>>, vector<16x8xf32>,
    %c0_60 = arith.constant 0 : index
    %c256 = arith.constant 256 : index
    %135 = vector.load %arg13[%c0_60, %c256] : memref<16x512xf32, #tpu.memory_space<vmem>>, vector<16x8xf32>
    tpu.vector_store %arg13[%c0_60, %c256], %101 {strides = array<i32>} : memref<16x512xf32, #tpu.memory_space<vmem>>, vector<16x8xf32>,
    %c0_61 = arith.constant 0 : index
    %c384 = arith.constant 384 : index
    %136 = vector.load %arg13[%c0_61, %c384] : memref<16x512xf32, #tpu.memory_space<vmem>>, vector<16x1xf32>
    tpu.vector_store %arg13[%c0_61, %c384], %128 {strides = array<i32>} : memref<16x512xf32, #tpu.memory_space<vmem>>, vector<16x1xf32>,
    return
  }
  func.func @transform_0(%arg0: i32) -> (i32, i32) {
    %c0_i32 = arith.constant 0 : i32
    %c0_i32_0 = arith.constant 0 : i32
    return %arg0, %c0_i32 : i32, i32
  }
  func.func @transform_1(%arg0: i32) -> (i32, i32) {
    %c0_i32 = arith.constant 0 : i32
    %c0_i32_0 = arith.constant 0 : i32
    return %arg0, %c0_i32 : i32, i32
  }
  func.func @transform_2(%arg0: i32) -> (i32, i32) {
    %c0_i32 = arith.constant 0 : i32
    %c0_i32_0 = arith.constant 0 : i32
    %c0_i32_1 = arith.constant 0 : i32
    return %c0_i32, %c0_i32_0 : i32, i32
  }
  func.func @transform_3(%arg0: i32) -> (i32, i32) {
    %c0_i32 = arith.constant 0 : i32
    %c0_i32_0 = arith.constant 0 : i32
    %c0_i32_1 = arith.constant 0 : i32
    return %c0_i32, %c0_i32_0 : i32, i32
  }
  func.func @transform_4(%arg0: i32) -> (i32, i32) {
    %c0_i32 = arith.constant 0 : i32
    %c0_i32_0 = arith.constant 0 : i32
    %c0_i32_1 = arith.constant 0 : i32
    return %c0_i32, %c0_i32_0 : i32, i32
  }
  func.func @transform_5(%arg0: i32) -> (i32, i32) {
    %c0_i32 = arith.constant 0 : i32
    %c0_i32_0 = arith.constant 0 : i32
    %c0_i32_1 = arith.constant 0 : i32
    return %c0_i32, %c0_i32_0 : i32, i32
  }
  func.func @transform_6(%arg0: i32) -> (i32, i32) {
    %c0_i32 = arith.constant 0 : i32
    %c0_i32_0 = arith.constant 0 : i32
    %c0_i32_1 = arith.constant 0 : i32
    return %c0_i32, %c0_i32_0 : i32, i32
  }
  func.func @transform_7(%arg0: i32) -> (i32, i32) {
    %c0_i32 = arith.constant 0 : i32
    %c0_i32_0 = arith.constant 0 : i32
    %c0_i32_1 = arith.constant 0 : i32
    return %c0_i32, %c0_i32_0 : i32, i32
  }
  func.func @transform_8(%arg0: i32) -> (i32, i32) {
    %c0_i32 = arith.constant 0 : i32
    %c0_i32_0 = arith.constant 0 : i32
    %c0_i32_1 = arith.constant 0 : i32
    return %c0_i32, %c0_i32_0 : i32, i32
  }
  func.func @transform_9(%arg0: i32) -> (i32, i32) {
    %c0_i32 = arith.constant 0 : i32
    %c0_i32_0 = arith.constant 0 : i32
    %c0_i32_1 = arith.constant 0 : i32
    return %c0_i32, %c0_i32_0 : i32, i32
  }
  func.func @transform_10(%arg0: i32) -> (i32, i32) {
    %c0_i32 = arith.constant 0 : i32
    %c0_i32_0 = arith.constant 0 : i32
    %c0_i32_1 = arith.constant 0 : i32
    return %c0_i32, %c0_i32_0 : i32, i32
  }
  func.func @transform_11(%arg0: i32) -> (i32, i32) {
    %c0_i32 = arith.constant 0 : i32
    %c0_i32_0 = arith.constant 0 : i32
    %c0_i32_1 = arith.constant 0 : i32
    return %c0_i32, %c0_i32_0 : i32, i32
  }
  func.func @transform_12(%arg0: i32) -> (i32, i32) {
    %c0_i32 = arith.constant 0 : i32
    %c0_i32_0 = arith.constant 0 : i32
    return %arg0, %c0_i32 : i32, i32
  }
}

</mosaic_0001>

<bundles_post_ra>
// kernel: tpu_custom_call.1
= control target key start
LH: loop header
LB: loop body
LE: loop exit
PB: predicated region body
PF: predicated region fallthrough
CT: control target
= control target key end

     0   :  { %17 = vsyncpa [#allocation3], 0  ;;  %s3276_s0 = inlined_call_operand.vmem [shape: f32[16,32], index: 0, kind: input, shape index: {}]   ;;  %s3277_s1 = inlined_call_operand.vmem [shape: f32[16,8], index: 1, kind: input, shape index: {}]   ;;  %s3278_s2 = inlined_call_operand.hbm [shape: bf16[32,512], index: 2, kind: input, shape index: {}]   ;;  %s3279_s3 = inlined_call_operand.vmem [shape: f32[1,512], index: 3, kind: input, shape index: {}]   ;;  %s3280_s4 = inlined_call_operand.vmem [shape: f32[1,512], index: 4, kind: input, shape index: {}]   ;;  %s3281_s5 = inlined_call_operand.vmem [shape: f32[1,512], index: 5, kind: input, shape index: {}]   ;;  %s3282_s6 = inlined_call_operand.hbm [shape: bf16[512,512], index: 6, kind: input, shape index: {}]   ;;  %s3283_s7 = inlined_call_operand.vmem [shape: f32[1,512], index: 7, kind: input, shape index: {}]   ;;  %s3284_s8 = inlined_call_operand.vmem [shape: f32[1,512], index: 8, kind: input, shape index: {}]   ;;  %s3285_s9 = inlined_call_operand.vmem [shape: f32[1,512], index: 9, kind: input, shape index: {}]   ;;  %s3286_s10 = inlined_call_operand.hbm [shape: bf16[512,256], index: 10, kind: input, shape index: {}]   ;;  %s3287_s11 = inlined_call_operand.vmem [shape: f32[1,256], index: 11, kind: input, shape index: {}]   ;;  %s3288_s12 = inlined_call_operand.hbm [shape: f32[16,512], index: 12, kind: output, shape index: {}]  }
   0x1   :  { %18 = vsyncpa [#allocation6], 0 }
   0x2   :  { %19 = vsyncpa [#allocation4], 0  ;;  %s2890_s21 = smov [#allocation5]   ;;  %s2891_s23 = smov [#allocation2]  }
   0x3   :  { %s47_s22 = sshll.u32 %s2890_s21, 4  ;;  %s29_s24 = sshll.u32 %s2891_s23, 4  ;;  %s48_s22 = int_to_ptr.vmem [resolvable:$true] %s47_s22  ;;  %s2966_s24 = int_to_ptr.vmem [resolvable:$true] %s29_s24 }
   0x4   :  { %s2796_s27 = scalar_lea.hbm %s3282_s6, 16384 }
   0x5   :  { %p2797_p0 = scmp.ne.s32.totalorder %s3282_s6, %s2796_s27  ;;  %p2800_p1 = scmp.lt.u32.totalorder %s2796_s27, %s3282_s6 }
   0x7   :  { %p2802_p2 = pnand %p2800_p1, %p2797_p0 }
   0x9   :  { %2805 = shalt.err (!%p2802_p2)
}
   0xa   :  { %s2806_s14 = scalar_lea.vmem %s48_s22, 16384  ;;  %p2811_p4 = scmp.lt.s32.totalorder %s48_s22, %s48_s22 }
   0xb   :  { %p2807_p3 = scmp.ne.s32.totalorder %s48_s22, %s2806_s14  ;;  %p2812_p5 = scmp.lt.s32.totalorder %s2806_s14, %s2806_s14 }
   0xd   :  { %p2813_p6 = por %p2812_p5, %p2811_p4 }
   0xf   :  { %p2814_p7 = pnand %p2813_p6, %p2807_p3 }
  0x11   :  { %2817 = shalt.err (!%p2814_p7)
}
  0x12   :  { %s2892_s15 = smov 256   ;;  %s2893_s16 = smov 16  }
  0x13   :  { %53 = dma.hbm_to_vmem [thread:$0]  %s3282_s6, 16384, %s48_s22, [#allocation6], %s2892_s15, %s2892_s15, %s2893_s16  }
  0x14   :  { %s2818_s21 = scalar_lea.hbm %s3278_s2, 1024 }
  0x15   :  { %p2819_p8 = scmp.ne.s32.totalorder %s3278_s2, %s2818_s21  ;;  %p2822_p9 = scmp.lt.u32.totalorder %s2818_s21, %s3278_s2 }
  0x17   :  { %p2824_p10 = pnand %p2822_p9, %p2819_p8 }
  0x19   :  { %2827 = shalt.err (!%p2824_p10)
}
  0x1a   :  { %s2828_s28 = scalar_lea.vmem %s2966_s24, 1024  ;;  %p2833_p12 = scmp.lt.s32.totalorder %s2966_s24, %s2966_s24 }
  0x1b   :  { %p2829_p11 = scmp.ne.s32.totalorder %s2966_s24, %s2828_s28  ;;  %p2834_p13 = scmp.lt.s32.totalorder %s2828_s28, %s2828_s28 }
  0x1d   :  { %p2835_p0 = por %p2834_p13, %p2833_p12 }
  0x1f   :  { %p2836_p1 = pnand %p2835_p0, %p2829_p11 }
  0x21   :  { %2839 = shalt.err (!%p2836_p1)
}
  0x22   :  { %35 = dma.hbm_to_vmem [thread:$0]  %s3278_s2, 1024, %s2966_s24, [#allocation3], %s2892_s15, %s2892_s15, %s2893_s16  }
  0x23   :  { %s2894_s29 = smov [#allocation7]   ;;  %s2840_s17 = scalar_lea.hbm %s3286_s10, 8192 }
  0x24   :  { %s65_s30 = sshll.u32 %s2894_s29, 4  ;;  %p2841_p2 = scmp.ne.s32.totalorder %s3286_s10, %s2840_s17  ;;  %s66_s30 = int_to_ptr.vmem [resolvable:$true] %s65_s30 }
  0x25   :  { %p2844_p3 = scmp.lt.u32.totalorder %s2840_s17, %s3286_s10 }
  0x27   :  { %p2846_p4 = pnand %p2844_p3, %p2841_p2 }
  0x29   :  { %2849 = shalt.err (!%p2846_p4)
}
  0x2a   :  { %s2850_s23 = scalar_lea.vmem %s66_s30, 8192  ;;  %p2855_p6 = scmp.lt.s32.totalorder %s66_s30, %s66_s30 }
  0x2b   :  { %p2851_p5 = scmp.ne.s32.totalorder %s66_s30, %s2850_s23  ;;  %p2856_p7 = scmp.lt.s32.totalorder %s2850_s23, %s2850_s23 }
  0x2d   :  { %p2857_p8 = por %p2856_p7, %p2855_p6 }
  0x2f   :  { %p2858_p9 = pnand %p2857_p8, %p2851_p5 }
  0x31   :  { %2861 = shalt.err (!%p2858_p9)
}
  0x32   :  { %s2895_s2 = smov 128   ;;  %s2896_s24 = smov 8  }
  0x33   :  { %71 = dma.hbm_to_vmem [thread:$0]  %s3286_s10, 8192, %s66_s30, [#allocation6], %s2895_s2, %s2895_s2, %s2896_s24  }
  0x34   :  { %2884 = dma.done.wait [#allocation3], 1024  }
  0x35   :  { %2885 = vsyncadd [#allocation3], 4294966272 }
  0x36   :  { %2886 = dma.done.wait [#allocation6], 24576  }
  0x37   :  { %2887 = vsyncadd [#allocation6], 4294942720  ;;  %v2897_v0 = vmov 0   ;;  %v2404_v1 = vld [vmem:[#allocation2 + $0x4] ss:$16 sps:$4 sm:$0xff]   ;;  %v85_v10 = vld [vmem:[%s3276_s0 + $0x8] sm:$0xff]  ;;  %v99_v12 = vlaneseq }
  0x38   :  { %195 = vmatprep.mubr.bf16.mxu0 %v2897_v0  ;;  %238 = vmatprep.mubr.bf16.mxu1 %v2897_v0  ;;  %v2406_v2 = vld [vmem:[#allocation2 + $0xc] ss:$16 sps:$4 sm:$0xff]   ;;  %v2408_v3 = vld [vmem:[#allocation2] ss:$16 sps:$4 sm:$0xff]   ;;  %v2409_v4 = vld [vmem:[#allocation2 + $0x8] ss:$16 sps:$4 sm:$0xff]  }
  0x39   :  { %163 = vmatprep.subr.bf16.mxu0 %v2404_v1  ;;  %206 = vmatprep.subr.bf16.mxu1 %v2406_v2  ;;  %v2410_v5 = vld [vmem:[#allocation2 + $0x24] ss:$16 sps:$4 sm:$0xff]   ;;  %v2412_v6 = vld [vmem:[#allocation2 + $0x2c] ss:$16 sps:$4 sm:$0xff]   ;;  %v2414_v7 = vld [vmem:[#allocation2 + $0x20] ss:$16 sps:$4 sm:$0xff]  }
  0x3a   :  { %164 = vmatpush1.bf16.msra.mxu0 %v2408_v3  ;;  %207 = vmatpush1.bf16.msra.mxu1 %v2409_v4  ;;  %v2415_v8 = vld [vmem:[#allocation2 + $0x28] ss:$16 sps:$4 sm:$0xff]   ;;  %v84_v9 = vld [vmem:[%s3276_s0] sm:$0xff]  ;;  %vm159_vm0 = vcmask 261120   ;;  %v100_v13 = vshrl.u32 %v99_v12, 7  ;;  %vm2109_vm1 = vcmask 64512  }
  0x3b   :  { %165 = vmatprep.subr.bf16.mxu0 %v2410_v5  ;;  %208 = vmatprep.subr.bf16.mxu1 %v2412_v6  ;;  %v97_v11 = vpack.c.bf16 %v85_v10, %v84_v9  ;;  %v94_v16 = vld [vmem:[%s3279_s3] sm:$0xf]  ;;  %v2418_v59 = vld [vmem:[#allocation5 + $0x4] ss:$16 sps:$4 sm:$0xff]   ;;  %vm2146_vm2 = vcmask 7168  }
  0x3c   :  { %v3015_v14 = vsub.s32 0, %v100_v13  ;;  %v3017_v15 = vsub.s32 2, %v100_v13  ;;  %v3022_v17 = vsub.s32 1, %v100_v13  ;;  %v3024_v18 = vsub.s32 3, %v100_v13  ;;  %v2416_v60 = vld [vmem:[#allocation5] ss:$16 sps:$4 sm:$0xff]  }
  0x3d   :  { %v2421_v61 = vld [vmem:[#allocation5 + $0x204] ss:$16 sps:$4 sm:$0xff]   ;;  %v2419_v62 = vld [vmem:[#allocation5 + $0x200] ss:$16 sps:$4 sm:$0xff]  }
  0x3e   :  { %166 = vmatpush1.bf16.msra.mxu0 %v2414_v7  ;;  %209 = vmatpush1.bf16.msra.mxu1 %v2415_v8  ;;  %v102_v19 = vrot.slane %v94_v16, %v3015_v14  ;;  %v110_v20 = vrot.slane %v94_v16, %v3017_v15  ;;  %v106_v21 = vrot.slane %v94_v16, %v3022_v17  ;;  %v2424_v63 = vld [vmem:[#allocation5 + $0x24] ss:$16 sps:$4 sm:$0xff]   ;;  %v2422_v0 = vld [vmem:[#allocation5 + $0x20] ss:$16 sps:$4 sm:$0xff]  }
  0x3f   :  { %v114_v22 = vrot.slane %v94_v16, %v3024_v18  ;;  %1233 = vmatprep.subr.bf16.mxu1 %v2418_v59  ;;  %1276 = vmatprep.subr.bf16.mxu0 %v2421_v61  ;;  %v2427_v1 = vld [vmem:[#allocation5 + $0x224] ss:$16 sps:$4 sm:$0xff]   ;;  %v2425_v2 = vld [vmem:[#allocation5 + $0x220] ss:$16 sps:$4 sm:$0xff]  }
  0x40   :  { %v2430_v3 = vld [vmem:[#allocation5 + $0x44] ss:$16 sps:$4 sm:$0xff]   ;;  %v2428_v4 = vld [vmem:[#allocation5 + $0x40] ss:$16 sps:$4 sm:$0xff]  }
  0x41   :  { %2175 = vmatmul.mubr.msk.bf16.vlgmr.msra.gmra.mrb[0].mxu0 %vm159_vm0, %v97_v11  ;;  %2176 = vmatmul.mubr.msk.bf16.vlgmr.msra.gmra.mrb[0].mxu1 %vm159_vm0, %v97_v11  ;;  %v2433_v5 = vld [vmem:[#allocation5 + $0x244] ss:$16 sps:$4 sm:$0xff]   ;;  %v2431_v6 = vld [vmem:[#allocation5 + $0x240] ss:$16 sps:$4 sm:$0xff]  }
  0x42   :  { %1234 = vmatpush1.bf16.msra.mxu1 %v2416_v60  ;;  %1277 = vmatpush1.bf16.msra.mxu0 %v2419_v62  ;;  %v2434_v7 = vld [vmem:[#allocation5 + $0x60] ss:$16 sps:$4 sm:$0xff]   ;;  %v2436_v8 = vld [vmem:[#allocation5 + $0x64] ss:$16 sps:$4 sm:$0xff]  }
  0x43   :  { %1235 = vmatprep.subr.bf16.mxu1 %v2424_v63  ;;  %1278 = vmatprep.subr.bf16.mxu0 %v2427_v1  ;;  %v2437_v9 = vld [vmem:[#allocation5 + $0x260] ss:$16 sps:$4 sm:$0xff]   ;;  %v2439_v10 = vld [vmem:[#allocation5 + $0x264] ss:$16 sps:$4 sm:$0xff]  }
  0x44   :  { %v2442_v11 = vld [vmem:[#allocation5 + $0x84] ss:$16 sps:$4 sm:$0xff]   ;;  %v2440_v13 = vld [vmem:[#allocation5 + $0x80] ss:$16 sps:$4 sm:$0xff]  }
  0x45   :  { %v2445_v12 = vld [vmem:[#allocation5 + $0x284] ss:$16 sps:$4 sm:$0xff]   ;;  %v2443_v16 = vld [vmem:[#allocation5 + $0x280] ss:$16 sps:$4 sm:$0xff]  }
  0x46   :  { %1236 = vmatpush1.bf16.msra.mxu1 %v2422_v0  ;;  %1279 = vmatpush1.bf16.msra.mxu0 %v2425_v2  ;;  %v2496_v59 = vld [vmem:[#allocation5 + $0x1a4] ss:$16 sps:$4 sm:$0xff]   ;;  %v2494_v61 = vld [vmem:[#allocation5 + $0x1a0] ss:$16 sps:$4 sm:$0xff]  }
  0x47   :  { %1237 = vmatprep.subr.bf16.mxu1 %v2430_v3  ;;  %1280 = vmatprep.subr.bf16.mxu0 %v2433_v5  ;;  %v2499_v60 = vld [vmem:[#allocation5 + $0x3a4] ss:$16 sps:$4 sm:$0xff]   ;;  %v2497_v62 = vld [vmem:[#allocation5 + $0x3a0] ss:$16 sps:$4 sm:$0xff]  }
  0x48   :  { %v2502_v63 = vld [vmem:[#allocation5 + $0x1c4] ss:$16 sps:$4 sm:$0xff]   ;;  %v2500_v1 = vld [vmem:[#allocation5 + $0x1c0] ss:$16 sps:$4 sm:$0xff]  }
  0x49   :  { %v2505_v0 = vld [vmem:[#allocation5 + $0x3c4] ss:$16 sps:$4 sm:$0xff]   ;;  %v2503_v2 = vld [vmem:[#allocation5 + $0x3c0] ss:$16 sps:$4 sm:$0xff]  }
  0x4a   :  { %1238 = vmatpush1.bf16.msra.mxu1 %v2428_v4  ;;  %1281 = vmatpush1.bf16.msra.mxu0 %v2431_v6  ;;  %v2508_v3 = vld [vmem:[#allocation5 + $0x1e4] ss:$16 sps:$4 sm:$0xff]   ;;  %v2506_v5 = vld [vmem:[#allocation5 + $0x1e0] ss:$16 sps:$4 sm:$0xff]  }
  0x4b   :  { %1239 = vmatprep.subr.bf16.mxu1 %v2436_v8  ;;  %1282 = vmatprep.subr.bf16.mxu0 %v2439_v10  ;;  %v2511_v4 = vld [vmem:[#allocation5 + $0x3e4] ss:$16 sps:$4 sm:$0xff]   ;;  %v2509_v6 = vld [vmem:[#allocation5 + $0x3e0] ss:$16 sps:$4 sm:$0xff]  }
  0x4e   :  { %1240 = vmatpush1.bf16.msra.mxu1 %v2434_v7  ;;  %1283 = vmatpush1.bf16.msra.mxu0 %v2437_v9  ;;  %v2514_v7 = vld [vmem:[#allocation5 + $0xc] ss:$16 sps:$4 sm:$0xff]  }
  0x4f   :  { %1241 = vmatprep.subr.bf16.mxu1 %v2442_v11  ;;  %1284 = vmatprep.subr.bf16.mxu0 %v2445_v12 }
  0x52   :  { %1242 = vmatpush1.bf16.msra.mxu1 %v2440_v13  ;;  %1285 = vmatpush1.bf16.msra.mxu0 %v2443_v16 }
 0x114   :  { %v197_v23 = vpop.f32.mrb[0].mxu0  ;;  %v240_v24 = vpop.f32.mrb[0].mxu1 }
 0x115   :  { %v3030_v25 = vadd.f32 %v197_v23, %v102_v19  ;;  %v3032_v26 = vadd.f32 %v240_v24, %v110_v20  ;;  %v199_v27 = vpop.f32.mrb[1].mxu0  ;;  %v242_v28 = vpop.f32.mrb[1].mxu1  ;;  %v2454_v23 = vld [vmem:[#allocation5 + $0xc4] ss:$16 sps:$4 sm:$0xff]  }
 0x116   :  { %v3034_v29 = vadd.f32 %v199_v27, %v106_v21  ;;  %v201_v30 = vpop.f32.mrb[2].mxu0  ;;  %v244_v31 = vpop.f32.mrb[2].mxu1  ;;  %v3038_v33 = vadd.f32 %v242_v28, %v114_v22  ;;  %v2457_v24 = vld [vmem:[#allocation5 + $0x2c4] ss:$16 sps:$4 sm:$0xff]   ;;  %v2452_v27 = vld [vmem:[#allocation5 + $0xc0] ss:$16 sps:$4 sm:$0xff]  }
 0x117   :  { %v261_v32 = vmul.f32 %v3030_v25, %v3030_v25  ;;  %v3040_v34 = vadd.f32 %v201_v30, %v102_v19  ;;  %v3042_v35 = vadd.f32 %v244_v31, %v110_v20  ;;  %v203_v36 = vpop.f32.mrb[3].mxu0  ;;  %v246_v37 = vpop.f32.mrb[3].mxu1  ;;  %v263_v41 = vmul.f32 %v3032_v26, %v3032_v26  ;;  %v2448_v19 = vld [vmem:[#allocation5 + $0xa4] ss:$16 sps:$4 sm:$0xff]   ;;  %v2455_v28 = vld [vmem:[#allocation5 + $0x2c0] ss:$16 sps:$4 sm:$0xff]  }
 0x118   :  { %v262_v38 = vmul.f32 %v3034_v29, %v3034_v29  ;;  %v3046_v39 = vadd.f32 %v203_v36, %v106_v21  ;;  %v249_v40 = vadd.f32 %v3034_v29, %v3030_v25  ;;  %v3061_v48 = vadd.f32 %v246_v37, %v114_v22  ;;  %v2451_v20 = vld [vmem:[#allocation5 + $0x2a4] ss:$16 sps:$4 sm:$0xff]   ;;  %v2446_v21 = vld [vmem:[#allocation5 + $0xa0] ss:$16 sps:$4 sm:$0xff]   ;;  %1243 = vmatprep.subr.bf16.mxu1 %v2448_v19 }
 0x119   :  { %v265_v42 = vmul.f32 %v3040_v34, %v3040_v34  ;;  %v267_v47 = vmul.f32 %v3042_v35, %v3042_v35  ;;  %v264_v49 = vmul.f32 %v3038_v33, %v3038_v33  ;;  %v2449_v22 = vld [vmem:[#allocation5 + $0x2a0] ss:$16 sps:$4 sm:$0xff]   ;;  %1286 = vmatprep.subr.bf16.mxu0 %v2451_v20  ;;  %1244 = vmatpush1.bf16.msra.mxu1 %v2446_v21  ;;  %v2460_v30 = vld [vmem:[#allocation5 + $0xe4] ss:$16 sps:$4 sm:$0xff]  }
 0x11a   :  { %v254_v43 = vadd.f32 %v3046_v39, %v3040_v34  ;;  %v266_v44 = vmul.f32 %v3046_v39, %v3046_v39  ;;  %v250_v45 = vadd.f32 %v249_v40, %v3032_v26  ;;  %v269_v46 = vadd.f32 %v262_v38, %v261_v32  ;;  %1287 = vmatpush1.bf16.msra.mxu0 %v2449_v22  ;;  %v2463_v31 = vld [vmem:[#allocation5 + $0x2e4] ss:$16 sps:$4 sm:$0xff]   ;;  %v2458_v32 = vld [vmem:[#allocation5 + $0xe0] ss:$16 sps:$4 sm:$0xff]  }
 0x11b   :  { %v268_v57 = vmul.f32 %v3061_v48, %v3061_v48  ;;  %1245 = vmatprep.subr.bf16.mxu1 %v2454_v23  ;;  %1288 = vmatprep.subr.bf16.mxu0 %v2457_v24  ;;  %v2461_v36 = vld [vmem:[#allocation5 + $0x2e0] ss:$16 sps:$4 sm:$0xff]   ;;  %v2466_v37 = vld [vmem:[#allocation5 + $0x104] ss:$16 sps:$4 sm:$0xff]  }
 0x11c   :  { %v251_v50 = vadd.f32 %v250_v45, %v3038_v33  ;;  %v270_v51 = vadd.f32 %v269_v46, %v263_v41  ;;  %v255_v52 = vadd.f32 %v254_v43, %v3042_v35  ;;  %v274_v53 = vadd.f32 %v266_v44, %v265_v42  ;;  %v2469_v38 = vld [vmem:[#allocation5 + $0x304] ss:$16 sps:$4 sm:$0xff]   ;;  %v2464_v40 = vld [vmem:[#allocation5 + $0x100] ss:$16 sps:$4 sm:$0xff]  }
 0x11d   :  { %1246 = vmatpush1.bf16.msra.mxu1 %v2452_v27  ;;  %v2467_v41 = vld [vmem:[#allocation5 + $0x300] ss:$16 sps:$4 sm:$0xff]   ;;  %v2472_v42 = vld [vmem:[#allocation5 + $0x124] ss:$16 sps:$4 sm:$0xff]  }
 0x11e   :  { %252 = vadd.xlane.f32.xlu0 %v251_v50  ;;  %v271_v54 = vadd.f32 %v270_v51, %v264_v49  ;;  %v275_v55 = vadd.f32 %v274_v53, %v267_v47  ;;  %v256_v56 = vadd.f32 %v255_v52, %v3061_v48  ;;  %1289 = vmatpush1.bf16.msra.mxu0 %v2455_v28  ;;  %v2475_v43 = vld [vmem:[#allocation5 + $0x324] ss:$16 sps:$4 sm:$0xff]   ;;  %v2470_v44 = vld [vmem:[#allocation5 + $0x120] ss:$16 sps:$4 sm:$0xff]  }
 0x11f   :  { %1247 = vmatprep.subr.bf16.mxu1 %v2460_v30  ;;  %1290 = vmatprep.subr.bf16.mxu0 %v2463_v31  ;;  %v2473_v45 = vld [vmem:[#allocation5 + $0x320] ss:$16 sps:$4 sm:$0xff]   ;;  %v2478_v46 = vld [vmem:[#allocation5 + $0x144] ss:$16 sps:$4 sm:$0xff]  }
 0x120   :  { %272 = vadd.xlane.f32.xlu1 %v271_v54  ;;  %v276_v58 = vadd.f32 %v275_v55, %v268_v57  ;;  %v2481_v47 = vld [vmem:[#allocation5 + $0x344] ss:$16 sps:$4 sm:$0xff]   ;;  %v2476_v49 = vld [vmem:[#allocation5 + $0x140] ss:$16 sps:$4 sm:$0xff]  }
 0x121   :  { %1248 = vmatpush1.bf16.msra.mxu1 %v2458_v32  ;;  %v2479_v50 = vld [vmem:[#allocation5 + $0x340] ss:$16 sps:$4 sm:$0xff]   ;;  %v2484_v51 = vld [vmem:[#allocation5 + $0x164] ss:$16 sps:$4 sm:$0xff]  }
 0x122   :  { %257 = vadd.xlane.f32.xlu0 %v256_v56  ;;  %1291 = vmatpush1.bf16.msra.mxu0 %v2461_v36  ;;  %v2487_v52 = vld [vmem:[#allocation5 + $0x364] ss:$16 sps:$4 sm:$0xff]   ;;  %v2482_v53 = vld [vmem:[#allocation5 + $0x160] ss:$16 sps:$4 sm:$0xff]  }
 0x123   :  { %1249 = vmatprep.subr.bf16.mxu1 %v2466_v37  ;;  %1292 = vmatprep.subr.bf16.mxu0 %v2469_v38  ;;  %v2485_v54 = vld [vmem:[#allocation5 + $0x360] ss:$16 sps:$4 sm:$0xff]   ;;  %v2490_v55 = vld [vmem:[#allocation5 + $0x184] ss:$16 sps:$4 sm:$0xff]  }
 0x124   :  { %277 = vadd.xlane.f32.xlu1 %v276_v58  ;;  %v2493_v56 = vld [vmem:[#allocation5 + $0x384] ss:$16 sps:$4 sm:$0xff]   ;;  %v2488_v57 = vld [vmem:[#allocation5 + $0x180] ss:$16 sps:$4 sm:$0xff]  }
 0x125   :  { %1250 = vmatpush1.bf16.msra.mxu1 %v2464_v40  ;;  %v2491_v58 = vld [vmem:[#allocation5 + $0x380] ss:$16 sps:$4 sm:$0xff]  }
 0x126   :  { %1293 = vmatpush1.bf16.msra.mxu0 %v2467_v41  ;;  %1251 = vmatprep.subr.bf16.mxu1 %v2472_v42  ;;  %v95_v31 = vld [vmem:[%s3280_s4] sm:$0xf] }
 0x127   :  { %1294 = vmatprep.subr.bf16.mxu0 %v2475_v43  ;;  %v96_v32 = vld [vmem:[%s3281_s5] sm:$0xf]  ;;  %v315_v36 = vrot.slane %v95_v31, %v3022_v17  ;;  %v323_v37 = vrot.slane %v95_v31, %v3024_v18  ;;  %v311_v38 = vrot.slane %v95_v31, %v3015_v14  ;;  %v319_v40 = vrot.slane %v95_v31, %v3017_v15 }
 0x129   :  { %1252 = vmatpush1.bf16.msra.mxu1 %v2470_v44 }
 0x12a   :  { %1295 = vmatpush1.bf16.msra.mxu0 %v2473_v45  ;;  %1253 = vmatprep.subr.bf16.mxu1 %v2478_v46  ;;  %v344_v46 = vrot.slane %v96_v32, %v3022_v17 }
 0x12b   :  { %1296 = vmatprep.subr.bf16.mxu0 %v2481_v47  ;;  %v352_v47 = vrot.slane %v96_v32, %v3024_v18 }
 0x12d   :  { %1254 = vmatpush1.bf16.msra.mxu1 %v2476_v49 }
 0x12e   :  { %1297 = vmatpush1.bf16.msra.mxu0 %v2479_v50  ;;  %1255 = vmatprep.subr.bf16.mxu1 %v2484_v51 }
 0x12f   :  { %1298 = vmatprep.subr.bf16.mxu0 %v2487_v52 }
 0x131   :  { %1256 = vmatpush1.bf16.msra.mxu1 %v2482_v53 }
 0x132   :  { %1299 = vmatpush1.bf16.msra.mxu0 %v2485_v54  ;;  %1257 = vmatprep.subr.bf16.mxu1 %v2490_v55 }
 0x133   :  { %1300 = vmatprep.subr.bf16.mxu0 %v2493_v56 }
 0x135   :  { %1258 = vmatpush1.bf16.msra.mxu1 %v2488_v57 }
 0x136   :  { %1301 = vmatpush1.bf16.msra.mxu0 %v2491_v58  ;;  %1259 = vmatprep.subr.bf16.mxu1 %v2496_v59 }
 0x137   :  { %1302 = vmatprep.subr.bf16.mxu0 %v2499_v60 }
 0x139   :  { %1260 = vmatpush1.bf16.msra.mxu1 %v2494_v61 }
 0x13a   :  { %1303 = vmatpush1.bf16.msra.mxu0 %v2497_v62  ;;  %1261 = vmatprep.subr.bf16.mxu1 %v2502_v63 }
 0x13b   :  { %1304 = vmatprep.subr.bf16.mxu0 %v2505_v0 }
 0x13d   :  { %1262 = vmatpush1.bf16.msra.mxu1 %v2500_v1 }
 0x13e   :  { %1305 = vmatpush1.bf16.msra.mxu0 %v2503_v2  ;;  %1263 = vmatprep.subr.bf16.mxu1 %v2508_v3 }
 0x13f   :  { %1306 = vmatprep.subr.bf16.mxu0 %v2511_v4 }
 0x141   :  { %1264 = vmatpush1.bf16.msra.mxu1 %v2506_v5 }
 0x142   :  { %1307 = vmatpush1.bf16.msra.mxu0 %v2509_v6  ;;  %1319 = vmatprep.subr.bf16.mxu1 %v2514_v7 }
 0x1ab   :  { %v253_v8 = vpop.xlane.xlu0 %252 }
 0x1ac   :  { %v259_v9 = vmul.f32 0.001953125, %v253_v8 }
 0x1ad   :  { %v273_v10 = vpop.xlane.xlu1 %272 }
 0x1ae   :  { %v279_v11 = vmul.f32 0.001953125, %v273_v10  ;;  %v281_v12 = vmul.f32 %v259_v9, %v259_v9  ;;  %v287_v41 = vsub.f32 %v3030_v25, %v259_v9  ;;  %v288_v42 = vsub.f32 %v3034_v29, %v259_v9 }
 0x1af   :  { %v258_v13 = vpop.xlane.xlu0 %257  ;;  %v289_v43 = vsub.f32 %v3032_v26, %v259_v9  ;;  %v290_v44 = vsub.f32 %v3038_v33, %v259_v9  ;;  %v340_v25 = vrot.slane %v96_v32, %v3015_v14  ;;  %v348_v29 = vrot.slane %v96_v32, %v3017_v15 }
 0x1b0   :  { %v260_v16 = vmul.f32 0.001953125, %v258_v13  ;;  %v283_v19 = vsub.f32 %v279_v11, %v281_v12 }
 0x1b1   :  { %v278_v20 = vpop.xlane.xlu1 %277 }
 0x1b2   :  { %v285_v21 = vmax.f32 %v283_v19, 0.0  ;;  %v280_v22 = vmul.f32 0.001953125, %v278_v20  ;;  %v282_v23 = vmul.f32 %v260_v16, %v260_v16  ;;  %v292_v53 = vsub.f32 %v3046_v39, %v260_v16 }
 0x1b3   :  { %v294_v54 = vsub.f32 %v3061_v48, %v260_v16  ;;  %v291_v58 = vsub.f32 %v3040_v34, %v260_v16  ;;  %v293_v59 = vsub.f32 %v3042_v35, %v260_v16 }
 0x1b4   :  { %v295_v24 = vadd.f32 1e-05, %v285_v21  ;;  %v284_v27 = vsub.f32 %v280_v22, %v282_v23 }
 0x1b6   :  { %2704 = vrsqrt.f32 %v295_v24  ;;  %v286_v28 = vmax.f32 %v284_v27, 0.0 }
 0x1b8   :  { %v296_v30 = vadd.f32 1e-05, %v286_v28 }
 0x1ba   :  { %2706 = vrsqrt.f32 %v296_v30 }
 0x1c0   :  { %v2705_v45 = vpop.eup %2704 }
 0x1c1   :  { %v300_v49 = vmul.f32 %v2705_v45, %v288_v42  ;;  %v302_v50 = vmul.f32 %v2705_v45, %v290_v44  ;;  %v299_v51 = vmul.f32 %v2705_v45, %v287_v41  ;;  %v301_v52 = vmul.f32 %v2705_v45, %v289_v43 }
 0x1c3   :  { %v329_v26 = vmul.f32 %v315_v36, %v300_v49  ;;  %v331_v55 = vmul.f32 %v323_v37, %v302_v50  ;;  %v328_v33 = vmul.f32 %v311_v38, %v299_v51  ;;  %v330_v56 = vmul.f32 %v319_v40, %v301_v52 }
 0x1c4   :  { %v2707_v57 = vpop.eup %2706 }
 0x1c5   :  { %v304_v60 = vmul.f32 %v2707_v57, %v292_v53  ;;  %v3092_v61 = vadd.f32 %v344_v46, %v329_v26  ;;  %v306_v62 = vmul.f32 %v2707_v57, %v294_v54  ;;  %v3094_v39 = vadd.f32 %v352_v47, %v331_v55 }
 0x1c6   :  { %v303_v48 = vmul.f32 %v2707_v57, %v291_v58  ;;  %v3096_v63 = vadd.f32 %v340_v25, %v328_v33  ;;  %v305_v0 = vmul.f32 %v2707_v57, %v293_v59  ;;  %v3098_v1 = vadd.f32 %v348_v29, %v330_v56 }
 0x1c7   :  { %v333_v2 = vmul.f32 %v315_v36, %v304_v60  ;;  %v366_v3 = vmin.f32 %v3092_v61, 20.0  ;;  %v335_v4 = vmul.f32 %v323_v37, %v306_v62  ;;  %v368_v34 = vmin.f32 %v3094_v39, 20.0 }
 0x1c8   :  { %v332_v5 = vmul.f32 %v311_v38, %v303_v48  ;;  %v365_v35 = vmin.f32 %v3096_v63, 20.0  ;;  %v334_v6 = vmul.f32 %v319_v40, %v305_v0  ;;  %v367_v7 = vmin.f32 %v3098_v1, 20.0 }
 0x1c9   :  { %v3104_v8 = vadd.f32 %v344_v46, %v333_v2  ;;  %v375_v9 = vmul.f32 1.442695, %v366_v3  ;;  %v3106_v10 = vadd.f32 %v352_v47, %v335_v4  ;;  %v379_v11 = vmul.f32 1.442695, %v368_v34 }
 0x1ca   :  { %v3108_v12 = vadd.f32 %v340_v25, %v332_v5  ;;  %v373_v13 = vmul.f32 1.442695, %v365_v35  ;;  %v3110_v16 = vadd.f32 %v348_v29, %v334_v6  ;;  %v377_v19 = vmul.f32 1.442695, %v367_v7 }
 0x1cb   :  { %v370_v20 = vmin.f32 %v3104_v8, 20.0  ;;  %2708 = vpow2.f32 %v375_v9  ;;  %v372_v21 = vmin.f32 %v3106_v10, 20.0 }
 0x1cc   :  { %2710 = vpow2.f32 %v379_v11  ;;  %v369_v22 = vmin.f32 %v3108_v12, 20.0  ;;  %v371_v23 = vmin.f32 %v3110_v16, 20.0 }
 0x1cd   :  { %v383_v24 = vmul.f32 1.442695, %v370_v20  ;;  %v387_v27 = vmul.f32 1.442695, %v372_v21  ;;  %2712 = vpow2.f32 %v373_v13 }
 0x1ce   :  { %v381_v28 = vmul.f32 1.442695, %v369_v22  ;;  %2714 = vpow2.f32 %v377_v19  ;;  %v385_v30 = vmul.f32 1.442695, %v371_v23 }
 0x1cf   :  { %2716 = vpow2.f32 %v383_v24 }
 0x1d0   :  { %2718 = vpow2.f32 %v387_v27 }
 0x1d1   :  { %2720 = vpow2.f32 %v381_v28 }
 0x1d2   :  { %2722 = vpow2.f32 %v385_v30 }
 0x1d5   :  { %v2709_v31 = vpop.eup %2708 }
 0x1d6   :  { %v2711_v32 = vpop.eup %2710  ;;  %v390_v36 = vadd.f32 2.0, %v2709_v31 }
 0x1d7   :  { %v2713_v37 = vpop.eup %2712  ;;  %v392_v38 = vadd.f32 2.0, %v2711_v32 }
 0x1d8   :  { %v2715_v40 = vpop.eup %2714  ;;  %v398_v41 = vmul.f32 %v2709_v31, %v390_v36  ;;  %v389_v42 = vadd.f32 2.0, %v2713_v37 }
 0x1d9   :  { %v2717_v43 = vpop.eup %2716  ;;  %v400_v44 = vmul.f32 %v2711_v32, %v392_v38  ;;  %v391_v45 = vadd.f32 2.0, %v2715_v40  ;;  %v2512_v38 = vld [vmem:[#allocation5 + $0x8] ss:$16 sps:$4 sm:$0xff]  }
 0x1da   :  { %v2719_v46 = vpop.eup %2718  ;;  %v394_v47 = vadd.f32 2.0, %v2717_v43  ;;  %v406_v49 = vadd.f32 2.0, %v398_v41  ;;  %v397_v50 = vmul.f32 %v2713_v37, %v389_v42  ;;  %v2526_v42 = vld [vmem:[#allocation5 + $0x8c] ss:$16 sps:$4 sm:$0xff]  }
 0x1db   :  { %v2721_v51 = vpop.eup %2720  ;;  %v396_v52 = vadd.f32 2.0, %v2719_v46  ;;  %v408_v53 = vadd.f32 2.0, %v400_v44  ;;  %v399_v54 = vmul.f32 %v2715_v40, %v391_v45  ;;  %v2527_v45 = vld [vmem:[#allocation5 + $0xa8] ss:$16 sps:$4 sm:$0xff]  }
 0x1dc   :  { %v2723_v25 = vpop.eup %2722  ;;  %v402_v29 = vmul.f32 %v2717_v43, %v394_v47  ;;  %2724 = vrcp.f32 %v406_v49  ;;  %v393_v26 = vadd.f32 2.0, %v2721_v51  ;;  %v405_v55 = vadd.f32 2.0, %v397_v50  ;;  %v2524_v43 = vld [vmem:[#allocation5 + $0x88] ss:$16 sps:$4 sm:$0xff]   ;;  %v2535_v49 = vld [vmem:[#allocation5 + $0xec] ss:$16 sps:$4 sm:$0xff]  }
 0x1dd   :  { %v404_v33 = vmul.f32 %v2719_v46, %v396_v52  ;;  %2726 = vrcp.f32 %v408_v53  ;;  %v395_v56 = vadd.f32 2.0, %v2723_v25  ;;  %v407_v57 = vadd.f32 2.0, %v399_v54  ;;  %v2532_v46 = vld [vmem:[#allocation5 + $0xcc] ss:$16 sps:$4 sm:$0xff]   ;;  %v2530_v47 = vld [vmem:[#allocation5 + $0xc8] ss:$16 sps:$4 sm:$0xff]  }
 0x1de   :  { %v410_v58 = vadd.f32 2.0, %v402_v29  ;;  %v401_v59 = vmul.f32 %v2721_v51, %v393_v26  ;;  %2728 = vrcp.f32 %v405_v55  ;;  %v2538_v51 = vld [vmem:[#allocation5 + $0x10c] ss:$16 sps:$4 sm:$0xff]   ;;  %v2536_v52 = vld [vmem:[#allocation5 + $0x108] ss:$16 sps:$4 sm:$0xff]  }
 0x1df   :  { %v412_v60 = vadd.f32 2.0, %v404_v33  ;;  %v403_v62 = vmul.f32 %v2723_v25, %v395_v56  ;;  %2730 = vrcp.f32 %v407_v57  ;;  %v2541_v53 = vld [vmem:[#allocation5 + $0x12c] ss:$16 sps:$4 sm:$0xff]   ;;  %v2545_v55 = vld [vmem:[#allocation5 + $0x168] ss:$16 sps:$4 sm:$0xff]  }
 0x1e0   :  { %2732 = vrcp.f32 %v410_v58  ;;  %v409_v48 = vadd.f32 2.0, %v401_v59  ;;  %v2544_v25 = vld [vmem:[#allocation5 + $0x14c] ss:$16 sps:$4 sm:$0xff]   ;;  %v2548_v56 = vld [vmem:[#allocation5 + $0x188] ss:$16 sps:$4 sm:$0xff]  }
 0x1e1   :  { %2734 = vrcp.f32 %v412_v60  ;;  %v411_v0 = vadd.f32 2.0, %v403_v62  ;;  %v2547_v26 = vld [vmem:[#allocation5 + $0x16c] ss:$16 sps:$4 sm:$0xff]   ;;  %v2551_v58 = vld [vmem:[#allocation5 + $0x1a8] ss:$16 sps:$4 sm:$0xff]  }
 0x1e2   :  { %2736 = vrcp.f32 %v409_v48  ;;  %v2553_v57 = vld [vmem:[#allocation5 + $0x1ac] ss:$16 sps:$4 sm:$0xff]   ;;  %v2554_v60 = vld [vmem:[#allocation5 + $0x1c8] ss:$16 sps:$4 sm:$0xff]  }
 0x1e3   :  { %2738 = vrcp.f32 %v411_v0  ;;  %v2557_v48 = vld [vmem:[#allocation5 + $0x1e8] ss:$16 sps:$4 sm:$0xff]   ;;  %v2562_v0 = vld [vmem:[#allocation5 + $0x20c] ss:$16 sps:$4 sm:$0xff]  }
 0x1e6   :  { %v2725_v2 = vpop.eup %2724 }
 0x1e7   :  { %v2727_v3 = vpop.eup %2726  ;;  %v416_v5 = vmul.f32 %v2725_v2, %v398_v41  ;;  %v2517_v41 = vld [vmem:[#allocation5 + $0x2c] ss:$16 sps:$4 sm:$0xff]   ;;  %v2560_v2 = vld [vmem:[#allocation5 + $0x208] ss:$16 sps:$4 sm:$0xff]  }
 0x1e8   :  { %v2729_v4 = vpop.eup %2728  ;;  %v420_v6 = vmul.f32 %v2727_v3, %v400_v44  ;;  %v2529_v44 = vld [vmem:[#allocation5 + $0xac] ss:$16 sps:$4 sm:$0xff]  }
 0x1e9   :  { %v2731_v34 = vpop.eup %2730  ;;  %v414_v11 = vmul.f32 %v2729_v4, %v397_v50  ;;  %v430_v22 = vmul.f32 %v416_v5, %v3092_v61  ;;  %v2533_v50 = vld [vmem:[#allocation5 + $0xe8] ss:$16 sps:$4 sm:$0xff]   ;;  %v2565_v3 = vld [vmem:[#allocation5 + $0x22c] ss:$16 sps:$4 sm:$0xff]  }
 0x1ea   :  { %v2733_v35 = vpop.eup %2732  ;;  %v418_v20 = vmul.f32 %v2731_v34, %v399_v54  ;;  %v432_v27 = vmul.f32 %v420_v6, %v3094_v39  ;;  %v2539_v54 = vld [vmem:[#allocation5 + $0x128] ss:$16 sps:$4 sm:$0xff]   ;;  %v2568_v34 = vld [vmem:[#allocation5 + $0x24c] ss:$16 sps:$4 sm:$0xff]  }
 0x1eb   :  { %v2735_v7 = vpop.eup %2734  ;;  %v424_v9 = vmul.f32 %v2733_v35, %v402_v29  ;;  %v429_v32 = vmul.f32 %v414_v11, %v3096_v63  ;;  %v2515_v63 = vld [vmem:[#allocation5 + $0x28] ss:$16 sps:$4 sm:$0xff]   ;;  %v2571_v35 = vld [vmem:[#allocation5 + $0x26c] ss:$16 sps:$4 sm:$0xff]  }
 0x1ec   :  { %v2737_v13 = vpop.eup %2736  ;;  %v428_v19 = vmul.f32 %v2735_v7, %v404_v33  ;;  %v431_v40 = vmul.f32 %v418_v20, %v3098_v1  ;;  %v2518_v1 = vld [vmem:[#allocation5 + $0x48] ss:$16 sps:$4 sm:$0xff]   ;;  %v2550_v33 = vld [vmem:[#allocation5 + $0x18c] ss:$16 sps:$4 sm:$0xff]  }
 0x1ed   :  { %v2739_v21 = vpop.eup %2738  ;;  %v434_v23 = vmul.f32 %v424_v9, %v3104_v8  ;;  %v422_v24 = vmul.f32 %v2737_v13, %v401_v59  ;;  %v2542_v29 = vld [vmem:[#allocation5 + $0x148] ss:$16 sps:$4 sm:$0xff]   ;;  %v2556_v59 = vld [vmem:[#allocation5 + $0x1cc] ss:$16 sps:$4 sm:$0xff]  }
 0x1ee   :  { %v436_v28 = vmul.f32 %v428_v19, %v3106_v10  ;;  %v426_v30 = vmul.f32 %v2739_v21, %v403_v62  ;;  %v2520_v10 = vld [vmem:[#allocation5 + $0x4c] ss:$16 sps:$4 sm:$0xff]   ;;  %v2563_v4 = vld [vmem:[#allocation5 + $0x228] ss:$16 sps:$4 sm:$0xff]  }
 0x1ef   :  { %v569_v31 = vpack.c.bf16 %v434_v23, %v430_v22  ;;  %v433_v36 = vmul.f32 %v422_v24, %v3108_v12  ;;  %v2523_v12 = vld [vmem:[#allocation5 + $0x6c] ss:$16 sps:$4 sm:$0xff]   ;;  %v2566_v5 = vld [vmem:[#allocation5 + $0x248] ss:$16 sps:$4 sm:$0xff]  }
 0x1f0   :  { %v3122_v37 = vpack.c.bf16 %v436_v28, %v432_v27  ;;  %v435_v61 = vmul.f32 %v426_v30, %v3110_v16  ;;  %v2521_v16 = vld [vmem:[#allocation5 + $0x68] ss:$16 sps:$4 sm:$0xff]   ;;  %v2559_v62 = vld [vmem:[#allocation5 + $0x1ec] ss:$16 sps:$4 sm:$0xff]  }
 0x1f1   :  { %1265 = vmatprep.mubr.bf16.mxu1 %v569_v31  ;;  %v3126_v8 = vpack.c.bf16 %v433_v36, %v429_v32  ;;  %v2569_v6 = vld [vmem:[#allocation5 + $0x268] ss:$16 sps:$4 sm:$0xff]   ;;  %v2574_v7 = vld [vmem:[#allocation5 + $0x28c] ss:$16 sps:$4 sm:$0xff]  }
 0x1f2   :  { %1308 = vmatprep.mubr.bf16.mxu0 %v3122_v37  ;;  %v3129_v39 = vpack.c.bf16 %v435_v61, %v431_v40  ;;  %v2572_v9 = vld [vmem:[#allocation5 + $0x288] ss:$16 sps:$4 sm:$0xff]   ;;  %v2577_v11 = vld [vmem:[#allocation5 + $0x2ac] ss:$16 sps:$4 sm:$0xff]  }
 0x1f3   :  { %1266 = vmatmul.mubr.bf16.vlgmr.msra.gmra.mrb[4].mxu1 %v3126_v8  ;;  %v2575_v13 = vld [vmem:[#allocation5 + $0x2a8] ss:$16 sps:$4 sm:$0xff]   ;;  %v2580_v19 = vld [vmem:[#allocation5 + $0x2cc] ss:$16 sps:$4 sm:$0xff]  }
 0x1f4   :  { %1309 = vmatmul.mubr.bf16.vlgmr.msra.gmra.mrb[4].mxu0 %v3129_v39  ;;  %1320 = vmatpush1.bf16.msra.mxu1 %v2512_v38  ;;  %v2578_v20 = vld [vmem:[#allocation5 + $0x2c8] ss:$16 sps:$4 sm:$0xff]   ;;  %v2583_v21 = vld [vmem:[#allocation5 + $0x2ec] ss:$16 sps:$4 sm:$0xff]  }
 0x1f5   :  { %1351 = vmatprep.mubr.bf16.mxu1 %v569_v31  ;;  %1321 = vmatprep.subr.bf16.mxu1 %v2517_v41  ;;  %v2581_v22 = vld [vmem:[#allocation5 + $0x2e8] ss:$16 sps:$4 sm:$0xff]   ;;  %v2586_v23 = vld [vmem:[#allocation5 + $0x30c] ss:$16 sps:$4 sm:$0xff]  }
 0x1f6   :  { %v2584_v24 = vld [vmem:[#allocation5 + $0x308] ss:$16 sps:$4 sm:$0xff]   ;;  %v2589_v27 = vld [vmem:[#allocation5 + $0x32c] ss:$16 sps:$4 sm:$0xff]  }
 0x1f7   :  { %v2587_v28 = vld [vmem:[#allocation5 + $0x328] ss:$16 sps:$4 sm:$0xff]   ;;  %v2592_v30 = vld [vmem:[#allocation5 + $0x34c] ss:$16 sps:$4 sm:$0xff]  }
 0x1f8   :  { %1322 = vmatpush1.bf16.msra.mxu1 %v2515_v63  ;;  %v2590_v31 = vld [vmem:[#allocation5 + $0x348] ss:$16 sps:$4 sm:$0xff]   ;;  %v2595_v32 = vld [vmem:[#allocation5 + $0x36c] ss:$16 sps:$4 sm:$0xff]  }
 0x1f9   :  { %1323 = vmatprep.subr.bf16.mxu1 %v2520_v10  ;;  %v2593_v36 = vld [vmem:[#allocation5 + $0x368] ss:$16 sps:$4 sm:$0xff]   ;;  %v2601_v40 = vld [vmem:[#allocation5 + $0x3ac] ss:$16 sps:$4 sm:$0xff]  }
 0x1fa   :  { %v2596_v38 = vld [vmem:[#allocation5 + $0x388] ss:$16 sps:$4 sm:$0xff]   ;;  %v2607_v63 = vld [vmem:[#allocation5 + $0x3ec] ss:$16 sps:$4 sm:$0xff]  }
 0x1fb   :  { %v2599_v61 = vld [vmem:[#allocation5 + $0x3a8] ss:$16 sps:$4 sm:$0xff]  }
 0x1fc   :  { %1324 = vmatpush1.bf16.msra.mxu1 %v2518_v1  ;;  %v2602_v41 = vld [vmem:[#allocation5 + $0x3c8] ss:$16 sps:$4 sm:$0xff]   ;;  %v565_v1 = vld [vmem:[%s3283_s7] sm:$0xf] }
 0x1fd   :  { %1325 = vmatprep.subr.bf16.mxu1 %v2523_v12  ;;  %v2605_v10 = vld [vmem:[#allocation5 + $0x3e8] ss:$16 sps:$4 sm:$0xff]   ;;  %v576_v12 = vrot.slane %v565_v1, %v3015_v14 }
 0x200   :  { %1326 = vmatpush1.bf16.msra.mxu1 %v2521_v16  ;;  %v580_v16 = vrot.slane %v565_v1, %v3022_v17 }
 0x201   :  { %1327 = vmatprep.subr.bf16.mxu1 %v2526_v42 }
 0x204   :  { %1328 = vmatpush1.bf16.msra.mxu1 %v2524_v43 }
 0x205   :  { %1329 = vmatprep.subr.bf16.mxu1 %v2529_v44 }
 0x208   :  { %1330 = vmatpush1.bf16.msra.mxu1 %v2527_v45 }
 0x209   :  { %1331 = vmatprep.subr.bf16.mxu1 %v2532_v46 }
 0x20c   :  { %1332 = vmatpush1.bf16.msra.mxu1 %v2530_v47 }
 0x20d   :  { %1333 = vmatprep.subr.bf16.mxu1 %v2535_v49 }
 0x210   :  { %1334 = vmatpush1.bf16.msra.mxu1 %v2533_v50 }
 0x211   :  { %1335 = vmatprep.subr.bf16.mxu1 %v2538_v51 }
 0x214   :  { %1336 = vmatpush1.bf16.msra.mxu1 %v2536_v52 }
 0x215   :  { %1337 = vmatprep.subr.bf16.mxu1 %v2541_v53 }
 0x218   :  { %1338 = vmatpush1.bf16.msra.mxu1 %v2539_v54 }
 0x219   :  { %1339 = vmatprep.subr.bf16.mxu1 %v2544_v25 }
 0x21c   :  { %1340 = vmatpush1.bf16.msra.mxu1 %v2542_v29 }
 0x21d   :  { %1341 = vmatprep.subr.bf16.mxu1 %v2547_v26 }
 0x220   :  { %1342 = vmatpush1.bf16.msra.mxu1 %v2545_v55  ;;  %v584_v55 = vrot.slane %v565_v1, %v3017_v15 }
 0x221   :  { %1343 = vmatprep.subr.bf16.mxu1 %v2550_v33  ;;  %v588_v33 = vrot.slane %v565_v1, %v3024_v18  ;;  %v2623_v1 = vld [vmem:[#allocation7 + $0x50] ss:$8 sps:$4 sm:$0xff]  }
 0x224   :  { %1344 = vmatpush1.bf16.msra.mxu1 %v2548_v56 }
 0x225   :  { %1345 = vmatprep.subr.bf16.mxu1 %v2553_v57 }
 0x228   :  { %1346 = vmatpush1.bf16.msra.mxu1 %v2551_v58 }
 0x229   :  { %1347 = vmatprep.subr.bf16.mxu1 %v2556_v59 }
 0x22c   :  { %1348 = vmatpush1.bf16.msra.mxu1 %v2554_v60 }
 0x22d   :  { %1349 = vmatprep.subr.bf16.mxu1 %v2559_v62 }
 0x230   :  { %1350 = vmatpush1.bf16.msra.mxu1 %v2557_v48 }
 0x231   :  { %1362 = vmatprep.subr.bf16.mxu1 %v2562_v0 }
 0x233   :  { %1352 = vmatmul.mubr.bf16.vlgmr.msra.gmra.mrb[8].mxu1 %v3126_v8  ;;  %v2604_v8 = vld [vmem:[#allocation5 + $0x3cc] ss:$16 sps:$4 sm:$0xff]  }
 0x234   :  { %1363 = vmatpush1.bf16.msra.mxu1 %v2560_v2  ;;  %1394 = vmatprep.mubr.bf16.mxu1 %v3122_v37  ;;  %v2598_v37 = vld [vmem:[#allocation5 + $0x38c] ss:$16 sps:$4 sm:$0xff]  }
 0x235   :  { %1364 = vmatprep.subr.bf16.mxu1 %v2565_v3 }
 0x238   :  { %1365 = vmatpush1.bf16.msra.mxu1 %v2563_v4 }
 0x239   :  { %1366 = vmatprep.subr.bf16.mxu1 %v2568_v34 }
 0x23c   :  { %1367 = vmatpush1.bf16.msra.mxu1 %v2566_v5 }
 0x23d   :  { %1368 = vmatprep.subr.bf16.mxu1 %v2571_v35 }
 0x240   :  { %1369 = vmatpush1.bf16.msra.mxu1 %v2569_v6 }
 0x241   :  { %1370 = vmatprep.subr.bf16.mxu1 %v2574_v7 }
 0x244   :  { %1371 = vmatpush1.bf16.msra.mxu1 %v2572_v9 }
 0x245   :  { %1372 = vmatprep.subr.bf16.mxu1 %v2577_v11 }
 0x248   :  { %1373 = vmatpush1.bf16.msra.mxu1 %v2575_v13 }
 0x249   :  { %1374 = vmatprep.subr.bf16.mxu1 %v2580_v19 }
 0x24c   :  { %1375 = vmatpush1.bf16.msra.mxu1 %v2578_v20 }
 0x24d   :  { %1376 = vmatprep.subr.bf16.mxu1 %v2583_v21 }
 0x250   :  { %1377 = vmatpush1.bf16.msra.mxu1 %v2581_v22 }
 0x251   :  { %1378 = vmatprep.subr.bf16.mxu1 %v2586_v23 }
 0x254   :  { %1379 = vmatpush1.bf16.msra.mxu1 %v2584_v24 }
 0x255   :  { %1380 = vmatprep.subr.bf16.mxu1 %v2589_v27 }
 0x258   :  { %1381 = vmatpush1.bf16.msra.mxu1 %v2587_v28 }
 0x259   :  { %1382 = vmatprep.subr.bf16.mxu1 %v2592_v30 }
 0x25c   :  { %1383 = vmatpush1.bf16.msra.mxu1 %v2590_v31  ;;  %v2610_v31 = vld [vmem:[#allocation7 + $0x4] ss:$8 sps:$4 sm:$0xff]  }
 0x25d   :  { %1384 = vmatprep.subr.bf16.mxu1 %v2595_v32  ;;  %v2608_v32 = vld [vmem:[#allocation7] ss:$8 sps:$4 sm:$0xff]   ;;  %1993 = vmatprep.subr.bf16.mxu0 %v2610_v31 }
 0x25e   :  { %1994 = vmatpush1.bf16.msra.mxu0 %v2608_v32 }
 0x260   :  { %1385 = vmatpush1.bf16.msra.mxu1 %v2593_v36  ;;  %v2613_v36 = vld [vmem:[#allocation7 + $0x14] ss:$8 sps:$4 sm:$0xff]  }
 0x261   :  { %1386 = vmatprep.subr.bf16.mxu1 %v2598_v37  ;;  %v2611_v37 = vld [vmem:[#allocation7 + $0x10] ss:$8 sps:$4 sm:$0xff]   ;;  %1995 = vmatprep.subr.bf16.mxu0 %v2613_v36 }
 0x262   :  { %1996 = vmatpush1.bf16.msra.mxu0 %v2611_v37 }
 0x264   :  { %1387 = vmatpush1.bf16.msra.mxu1 %v2596_v38  ;;  %v2616_v38 = vld [vmem:[#allocation7 + $0x24] ss:$8 sps:$4 sm:$0xff]  }
 0x265   :  { %1388 = vmatprep.subr.bf16.mxu1 %v2601_v40  ;;  %v2614_v40 = vld [vmem:[#allocation7 + $0x20] ss:$8 sps:$4 sm:$0xff]   ;;  %1997 = vmatprep.subr.bf16.mxu0 %v2616_v38 }
 0x266   :  { %1998 = vmatpush1.bf16.msra.mxu0 %v2614_v40 }
 0x268   :  { %1389 = vmatpush1.bf16.msra.mxu1 %v2599_v61  ;;  %v2619_v61 = vld [vmem:[#allocation7 + $0x34] ss:$8 sps:$4 sm:$0xff]  }
 0x269   :  { %1390 = vmatprep.subr.bf16.mxu1 %v2604_v8  ;;  %v2617_v8 = vld [vmem:[#allocation7 + $0x30] ss:$8 sps:$4 sm:$0xff]   ;;  %1999 = vmatprep.subr.bf16.mxu0 %v2619_v61 }
 0x26a   :  { %2000 = vmatpush1.bf16.msra.mxu0 %v2617_v8 }
 0x26c   :  { %1391 = vmatpush1.bf16.msra.mxu1 %v2602_v41  ;;  %v2622_v41 = vld [vmem:[#allocation7 + $0x44] ss:$8 sps:$4 sm:$0xff]  }
 0x26d   :  { %1392 = vmatprep.subr.bf16.mxu1 %v2607_v63  ;;  %v2620_v63 = vld [vmem:[#allocation7 + $0x40] ss:$8 sps:$4 sm:$0xff]   ;;  %2001 = vmatprep.subr.bf16.mxu0 %v2622_v41 }
 0x26e   :  { %2002 = vmatpush1.bf16.msra.mxu0 %v2620_v63 }
 0x270   :  { %1393 = vmatpush1.bf16.msra.mxu1 %v2605_v10  ;;  %v2625_v10 = vld [vmem:[#allocation7 + $0x54] ss:$8 sps:$4 sm:$0xff]  }
 0x271   :  { %2003 = vmatprep.subr.bf16.mxu0 %v2625_v10 }
 0x272   :  { %2004 = vmatpush1.bf16.msra.mxu0 %v2623_v1 }
 0x273   :  { %1395 = vmatmul.mubr.bf16.vlgmr.msra.gmra.mrb[8].mxu1 %v3129_v39 }
 0x2c6   :  { %v1267_v42 = vpop.f32.mrb[4].mxu1 }
 0x2c7   :  { %v1268_v43 = vadd.f32 %v1267_v42, %v576_v12  ;;  %v1310_v44 = vpop.f32.mrb[4].mxu0  ;;  %v1269_v45 = vpop.f32.mrb[5].mxu1  ;;  %v2631_v42 = vld [vmem:[#allocation7 + $0x74] ss:$8 sps:$4 sm:$0xff]  }
 0x2c8   :  { %v1270_v46 = vadd.f32 %v1269_v45, %v580_v16  ;;  %v1312_v47 = vpop.f32.mrb[5].mxu0  ;;  %v1271_v49 = vpop.f32.mrb[6].mxu1  ;;  %v2632_v45 = vld [vmem:[#allocation7 + $0x80] ss:$8 sps:$4 sm:$0xff]  }
 0x2c9   :  { %v3141_v50 = vadd.f32 %v1310_v44, %v1268_v43  ;;  %v1272_v51 = vadd.f32 %v1271_v49, %v576_v12  ;;  %v1314_v52 = vpop.f32.mrb[6].mxu0  ;;  %v1273_v39 = vpop.f32.mrb[7].mxu1  ;;  %v2628_v12 = vld [vmem:[#allocation7 + $0x64] ss:$8 sps:$4 sm:$0xff]   ;;  %v2629_v43 = vld [vmem:[#allocation7 + $0x70] ss:$8 sps:$4 sm:$0xff]  }
 0x2ca   :  { %v3143_v53 = vadd.f32 %v1312_v47, %v1270_v46  ;;  %v1274_v54 = vadd.f32 %v1273_v39, %v580_v16  ;;  %v1316_v25 = vpop.f32.mrb[7].mxu0  ;;  %v2626_v16 = vld [vmem:[#allocation7 + $0x60] ss:$8 sps:$4 sm:$0xff]   ;;  %2005 = vmatprep.subr.bf16.mxu0 %v2628_v12  ;;  %v2634_v44 = vld [vmem:[#allocation7 + $0x84] ss:$8 sps:$4 sm:$0xff]  }
 0x2cb   :  { %v3145_v29 = vadd.f32 %v1314_v52, %v1272_v51  ;;  %v1417_v56 = vmul.f32 %v3141_v50, %v3141_v50  ;;  %2006 = vmatpush1.bf16.msra.mxu0 %v2626_v16  ;;  %v2637_v46 = vld [vmem:[#allocation7 + $0x94] ss:$8 sps:$4 sm:$0xff]   ;;  %v2635_v47 = vld [vmem:[#allocation7 + $0x90] ss:$8 sps:$4 sm:$0xff]   ;;  %v2640_v49 = vld [vmem:[#allocation7 + $0xa4] ss:$8 sps:$4 sm:$0xff]  }
 0x2cc   :  { %v3147_v26 = vadd.f32 %v1316_v25, %v1274_v54  ;;  %v1418_v57 = vmul.f32 %v3143_v53, %v3143_v53  ;;  %v1405_v62 = vadd.f32 %v3143_v53, %v3141_v50  ;;  %2007 = vmatprep.subr.bf16.mxu0 %v2631_v42  ;;  %v2638_v51 = vld [vmem:[#allocation7 + $0xa0] ss:$8 sps:$4 sm:$0xff]   ;;  %v2643_v52 = vld [vmem:[#allocation7 + $0xb4] ss:$8 sps:$4 sm:$0xff]   ;;  %v2641_v39 = vld [vmem:[#allocation7 + $0xb0] ss:$8 sps:$4 sm:$0xff]  }
 0x2cd   :  { %v1421_v58 = vmul.f32 %v3145_v29, %v3145_v29  ;;  %v2646_v54 = vld [vmem:[#allocation7 + $0xc4] ss:$8 sps:$4 sm:$0xff]   ;;  %v2644_v25 = vld [vmem:[#allocation7 + $0xc0] ss:$8 sps:$4 sm:$0xff]  }
 0x2ce   :  { %v1422_v59 = vmul.f32 %v3147_v26, %v3147_v26  ;;  %v1410_v2 = vadd.f32 %v3147_v26, %v3145_v29  ;;  %v1425_v7 = vadd.f32 %v1418_v57, %v1417_v56  ;;  %v2652_v56 = vld [vmem:[#allocation7 + $0xe4] ss:$8 sps:$4 sm:$0xff]   ;;  %v2650_v57 = vld [vmem:[#allocation7 + $0xe0] ss:$8 sps:$4 sm:$0xff]  }
 0x2cf   :  { %2008 = vmatpush1.bf16.msra.mxu0 %v2629_v43 }
 0x2d0   :  { %v1430_v13 = vadd.f32 %v1422_v59, %v1421_v58  ;;  %2009 = vmatprep.subr.bf16.mxu0 %v2634_v44  ;;  %v2655_v58 = vld [vmem:[#allocation7 + $0xf4] ss:$8 sps:$4 sm:$0xff]   ;;  %v2653_v59 = vld [vmem:[#allocation7 + $0xf0] ss:$8 sps:$4 sm:$0xff]  }
 0x2d3   :  { %2010 = vmatpush1.bf16.msra.mxu0 %v2632_v45 }
 0x2d4   :  { %2011 = vmatprep.subr.bf16.mxu0 %v2637_v46 }
 0x2d7   :  { %2012 = vmatpush1.bf16.msra.mxu0 %v2635_v47 }
 0x2d8   :  { %2013 = vmatprep.subr.bf16.mxu0 %v2640_v49 }
 0x2db   :  { %2014 = vmatpush1.bf16.msra.mxu0 %v2638_v51 }
 0x2dc   :  { %2015 = vmatprep.subr.bf16.mxu0 %v2643_v52 }
 0x2df   :  { %2016 = vmatpush1.bf16.msra.mxu0 %v2641_v39 }
 0x2e0   :  { %2017 = vmatprep.subr.bf16.mxu0 %v2646_v54 }
 0x2e3   :  { %2018 = vmatpush1.bf16.msra.mxu0 %v2644_v25 }
 0x346   :  { %v1396_v60 = vpop.f32.mrb[8].mxu1 }
 0x347   :  { %v3161_v48 = vadd.f32 %v1396_v60, %v584_v55  ;;  %v1398_v0 = vpop.f32.mrb[9].mxu1  ;;  %v2658_v60 = vld [vmem:[#allocation7 + $0x104] ss:$8 sps:$4 sm:$0xff]  }
 0x348   :  { %v3165_v3 = vadd.f32 %v1398_v0, %v588_v33  ;;  %v1400_v4 = vpop.f32.mrb[10].mxu1 }
 0x349   :  { %v1419_v34 = vmul.f32 %v3161_v48, %v3161_v48  ;;  %v3169_v5 = vadd.f32 %v1400_v4, %v584_v55  ;;  %v1402_v35 = vpop.f32.mrb[11].mxu1  ;;  %v1406_v6 = vadd.f32 %v3161_v48, %v1405_v62  ;;  %v2649_v55 = vld [vmem:[#allocation7 + $0xd4] ss:$8 sps:$4 sm:$0xff]  }
 0x34a   :  { %v3172_v9 = vadd.f32 %v1402_v35, %v588_v33  ;;  %v1420_v11 = vmul.f32 %v3165_v3, %v3165_v3  ;;  %v2647_v33 = vld [vmem:[#allocation7 + $0xd0] ss:$8 sps:$4 sm:$0xff]   ;;  %2019 = vmatprep.subr.bf16.mxu0 %v2649_v55 }
 0x34b   :  { %v1423_v19 = vmul.f32 %v3169_v5, %v3169_v5  ;;  %v1407_v20 = vadd.f32 %v3165_v3, %v1406_v6  ;;  %v1411_v21 = vadd.f32 %v3169_v5, %v1410_v2  ;;  %v1426_v22 = vadd.f32 %v1425_v7, %v1419_v34  ;;  %2020 = vmatpush1.bf16.msra.mxu0 %v2647_v33 }
 0x34c   :  { %v1424_v24 = vmul.f32 %v3172_v9, %v3172_v9  ;;  %2021 = vmatprep.subr.bf16.mxu0 %v2652_v56 }
 0x34d   :  { %1408 = vadd.xlane.f32.xlu0 %v1407_v20  ;;  %v1412_v23 = vadd.f32 %v3172_v9, %v1411_v21  ;;  %v1431_v27 = vadd.f32 %v1430_v13, %v1423_v19  ;;  %v1427_v28 = vadd.f32 %v1426_v22, %v1420_v11 }
 0x34f   :  { %1413 = vadd.xlane.f32.xlu1 %v1412_v23  ;;  %v1432_v30 = vadd.f32 %v1431_v27, %v1424_v24  ;;  %2022 = vmatpush1.bf16.msra.mxu0 %v2650_v57  ;;  %v566_v27 = vld [vmem:[%s3284_s8] sm:$0xf] }
 0x350   :  { %2023 = vmatprep.subr.bf16.mxu0 %v2655_v58  ;;  %v1467_v32 = vrot.slane %v566_v27, %v3015_v14  ;;  %v1479_v36 = vrot.slane %v566_v27, %v3024_v18  ;;  %v1475_v1 = vrot.slane %v566_v27, %v3017_v15 }
 0x351   :  { %1428 = vadd.xlane.f32.xlu0 %v1427_v28  ;;  %v567_v28 = vld [vmem:[%s3285_s9] sm:$0xf] }
 0x352   :  { %v1500_v31 = vrot.slane %v567_v28, %v3022_v17  ;;  %v1496_v10 = vrot.slane %v567_v28, %v3015_v14  ;;  %v1504_v44 = vrot.slane %v567_v28, %v3017_v15 }
 0x353   :  { %1433 = vadd.xlane.f32.xlu1 %v1432_v30  ;;  %2024 = vmatpush1.bf16.msra.mxu0 %v2653_v59  ;;  %v1471_v30 = vrot.slane %v566_v27, %v3022_v17 }
 0x354   :  { %2036 = vmatprep.subr.bf16.mxu0 %v2658_v60 }
 0x3da   :  { %v1409_v62 = vpop.xlane.xlu0 %1408 }
 0x3db   :  { %v1415_v0 = vmul.f32 0.001953125, %v1409_v62 }
 0x3dc   :  { %v1414_v2 = vpop.xlane.xlu1 %1413 }
 0x3dd   :  { %v1416_v4 = vmul.f32 0.001953125, %v1414_v2  ;;  %v1437_v35 = vmul.f32 %v1415_v0, %v1415_v0  ;;  %v1443_v37 = vsub.f32 %v3141_v50, %v1415_v0  ;;  %v1444_v38 = vsub.f32 %v3143_v53, %v1415_v0 }
 0x3de   :  { %v1429_v34 = vpop.xlane.xlu0 %1428  ;;  %v1445_v40 = vsub.f32 %v3161_v48, %v1415_v0  ;;  %v1446_v61 = vsub.f32 %v3165_v3, %v1415_v0  ;;  %v1508_v3 = vrot.slane %v567_v28, %v3024_v18 }
 0x3df   :  { %v1435_v6 = vmul.f32 0.001953125, %v1429_v34  ;;  %v1438_v13 = vmul.f32 %v1416_v4, %v1416_v4  ;;  %v1447_v41 = vsub.f32 %v3145_v29, %v1416_v4  ;;  %v1448_v63 = vsub.f32 %v3147_v26, %v1416_v4 }
 0x3e0   :  { %v1434_v7 = vpop.xlane.xlu1 %1433  ;;  %v1449_v53 = vsub.f32 %v3169_v5, %v1416_v4  ;;  %v1450_v48 = vsub.f32 %v3172_v9, %v1416_v4 }
 0x3e1   :  { %v1439_v11 = vsub.f32 %v1435_v6, %v1437_v35  ;;  %v1436_v19 = vmul.f32 0.001953125, %v1434_v7 }
 0x3e3   :  { %v1441_v20 = vmax.f32 %v1439_v11, 0.0  ;;  %v1440_v21 = vsub.f32 %v1436_v19, %v1438_v13 }
 0x3e5   :  { %v1451_v22 = vadd.f32 1e-05, %v1441_v20  ;;  %v1442_v23 = vmax.f32 %v1440_v21, 0.0 }
 0x3e7   :  { %2740 = vrsqrt.f32 %v1451_v22  ;;  %v1452_v24 = vadd.f32 1e-05, %v1442_v23 }
 0x3e9   :  { %2742 = vrsqrt.f32 %v1452_v24 }
 0x3f1   :  { %v2741_v8 = vpop.eup %2740 }
 0x3f2   :  { %v1456_v12 = vmul.f32 %v2741_v8, %v1444_v38  ;;  %v1455_v16 = vmul.f32 %v2741_v8, %v1443_v37  ;;  %v1458_v42 = vmul.f32 %v2741_v8, %v1446_v61  ;;  %v1457_v43 = vmul.f32 %v2741_v8, %v1445_v40 }
 0x3f3   :  { %v2743_v50 = vpop.eup %2742 }
 0x3f4   :  { %v1460_v29 = vmul.f32 %v2743_v50, %v1448_v63  ;;  %v1485_v45 = vmul.f32 %v1471_v30, %v1456_v12  ;;  %v1459_v26 = vmul.f32 %v2743_v50, %v1447_v41  ;;  %v1484_v46 = vmul.f32 %v1467_v32, %v1455_v16 }
 0x3f5   :  { %v1462_v47 = vmul.f32 %v2743_v50, %v1450_v48  ;;  %v1487_v49 = vmul.f32 %v1479_v36, %v1458_v42  ;;  %v1461_v51 = vmul.f32 %v2743_v50, %v1449_v53  ;;  %v1486_v52 = vmul.f32 %v1475_v1, %v1457_v43 }
 0x3f6   :  { %v1489_v39 = vmul.f32 %v1471_v30, %v1460_v29  ;;  %v3205_v54 = vadd.f32 %v1500_v31, %v1485_v45  ;;  %v1488_v25 = vmul.f32 %v1467_v32, %v1459_v26  ;;  %v3207_v55 = vadd.f32 %v1496_v10, %v1484_v46 }
 0x3f7   :  { %v1491_v5 = vmul.f32 %v1479_v36, %v1462_v47  ;;  %v3209_v9 = vadd.f32 %v1508_v3, %v1487_v49  ;;  %v1490_v18 = vmul.f32 %v1475_v1, %v1461_v51  ;;  %v3211_v33 = vadd.f32 %v1504_v44, %v1486_v52 }
 0x3f8   :  { %v3213_v15 = vadd.f32 %v1500_v31, %v1489_v39  ;;  %v1522_v56 = vmin.f32 %v3205_v54, 20.0  ;;  %v3216_v57 = vadd.f32 %v1496_v10, %v1488_v25  ;;  %v1521_v58 = vmin.f32 %v3207_v55, 20.0 }
 0x3f9   :  { %v3219_v59 = vadd.f32 %v1508_v3, %v1491_v5  ;;  %v1524_v60 = vmin.f32 %v3209_v9, 20.0  ;;  %v3222_v62 = vadd.f32 %v1504_v44, %v1490_v18  ;;  %v1523_v0 = vmin.f32 %v3211_v33, 20.0 }
 0x3fa   :  { %v1526_v2 = vmin.f32 %v3213_v15, 20.0  ;;  %v1531_v4 = vmul.f32 1.442695, %v1522_v56  ;;  %v1525_v34 = vmin.f32 %v3216_v57, 20.0  ;;  %v1529_v35 = vmul.f32 1.442695, %v1521_v58 }
 0x3fb   :  { %v1528_v6 = vmin.f32 %v3219_v59, 20.0  ;;  %v1527_v7 = vmin.f32 %v3222_v62, 20.0  ;;  %v1535_v19 = vmul.f32 1.442695, %v1524_v60  ;;  %v1533_v21 = vmul.f32 1.442695, %v1523_v0 }
 0x3fc   :  { %2744 = vpow2.f32 %v1531_v4  ;;  %v1539_v11 = vmul.f32 1.442695, %v1526_v2  ;;  %v1537_v13 = vmul.f32 1.442695, %v1525_v34 }
 0x3fd   :  { %2746 = vpow2.f32 %v1529_v35  ;;  %v1543_v20 = vmul.f32 1.442695, %v1528_v6  ;;  %v1541_v22 = vmul.f32 1.442695, %v1527_v7 }
 0x3fe   :  { %2748 = vpow2.f32 %v1539_v11 }
 0x3ff   :  { %2750 = vpow2.f32 %v1537_v13 }
 0x400   :  { %2752 = vpow2.f32 %v1535_v19 }
 0x401   :  { %2754 = vpow2.f32 %v1543_v20  ;;  %v2656_v20 = vld [vmem:[#allocation7 + $0x100] ss:$8 sps:$4 sm:$0xff]  }
 0x402   :  { %2756 = vpow2.f32 %v1533_v21 }
 0x403   :  { %2758 = vpow2.f32 %v1541_v22 }
 0x406   :  { %v2745_v23 = vpop.eup %2744 }
 0x407   :  { %v2747_v24 = vpop.eup %2746  ;;  %v1546_v27 = vadd.f32 2.0, %v2745_v23 }
 0x408   :  { %v2749_v28 = vpop.eup %2748  ;;  %v1545_v30 = vadd.f32 2.0, %v2747_v24 }
 0x409   :  { %v2751_v31 = vpop.eup %2750  ;;  %v1550_v32 = vadd.f32 2.0, %v2749_v28  ;;  %v1554_v36 = vmul.f32 %v2745_v23, %v1546_v27  ;;  %v2661_v27 = vld [vmem:[#allocation7 + $0x114] ss:$8 sps:$4 sm:$0xff]  }
 0x40a   :  { %v2753_v37 = vpop.eup %2752  ;;  %v1549_v38 = vadd.f32 2.0, %v2751_v31  ;;  %v1553_v40 = vmul.f32 %v2747_v24, %v1545_v30  ;;  %v2664_v30 = vld [vmem:[#allocation7 + $0x124] ss:$8 sps:$4 sm:$0xff]  }
 0x40b   :  { %v2755_v61 = vpop.eup %2754  ;;  %v1558_v8 = vmul.f32 %v2749_v28, %v1550_v32  ;;  %v1562_v41 = vadd.f32 2.0, %v1554_v36  ;;  %v1548_v63 = vadd.f32 2.0, %v2753_v37  ;;  %v2665_v32 = vld [vmem:[#allocation7 + $0x130] ss:$8 sps:$4 sm:$0xff]  }
 0x40c   :  { %v2757_v10 = vpop.eup %2756  ;;  %v1557_v1 = vmul.f32 %v2751_v31, %v1549_v38  ;;  %v1561_v12 = vadd.f32 2.0, %v1553_v40  ;;  %v1552_v16 = vadd.f32 2.0, %v2755_v61  ;;  %v2667_v31 = vld [vmem:[#allocation7 + $0x134] ss:$8 sps:$4 sm:$0xff]   ;;  %v2676_v38 = vld [vmem:[#allocation7 + $0x164] ss:$8 sps:$4 sm:$0xff]  }
 0x40d   :  { %v2759_v42 = vpop.eup %2758  ;;  %v1566_v43 = vadd.f32 2.0, %v1558_v8  ;;  %2760 = vrcp.f32 %v1562_v41  ;;  %v1556_v50 = vmul.f32 %v2753_v37, %v1548_v63  ;;  %v1547_v53 = vadd.f32 2.0, %v2757_v10  ;;  %v2671_v37 = vld [vmem:[#allocation7 + $0x150] ss:$8 sps:$4 sm:$0xff]   ;;  %v2682_v41 = vld [vmem:[#allocation7 + $0x184] ss:$8 sps:$4 sm:$0xff]  }
 0x40e   :  { %v1565_v48 = vadd.f32 2.0, %v1557_v1  ;;  %2762 = vrcp.f32 %v1561_v12  ;;  %v1560_v3 = vmul.f32 %v2755_v61, %v1552_v16  ;;  %v1551_v44 = vadd.f32 2.0, %v2759_v42  ;;  %v2679_v61 = vld [vmem:[#allocation7 + $0x174] ss:$8 sps:$4 sm:$0xff]   ;;  %v2680_v63 = vld [vmem:[#allocation7 + $0x180] ss:$8 sps:$4 sm:$0xff]  }
 0x40f   :  { %2764 = vrcp.f32 %v1566_v43  ;;  %v1564_v29 = vadd.f32 2.0, %v1556_v50  ;;  %v1555_v45 = vmul.f32 %v2757_v10, %v1547_v53  ;;  %v2685_v10 = vld [vmem:[#allocation7 + $0x194] ss:$8 sps:$4 sm:$0xff]   ;;  %v2688_v12 = vld [vmem:[#allocation7 + $0x1a4] ss:$8 sps:$4 sm:$0xff]  }
 0x410   :  { %2766 = vrcp.f32 %v1565_v48  ;;  %v1568_v26 = vadd.f32 2.0, %v1560_v3  ;;  %v1559_v46 = vmul.f32 %v2759_v42, %v1551_v44  ;;  %v2686_v16 = vld [vmem:[#allocation7 + $0x1a0] ss:$8 sps:$4 sm:$0xff]   ;;  %v2691_v42 = vld [vmem:[#allocation7 + $0x1b4] ss:$8 sps:$4 sm:$0xff]  }
 0x411   :  { %2768 = vrcp.f32 %v1564_v29  ;;  %v1563_v47 = vadd.f32 2.0, %v1555_v45  ;;  %v2689_v43 = vld [vmem:[#allocation7 + $0x1b0] ss:$8 sps:$4 sm:$0xff]   ;;  %v2692_v53 = vld [vmem:[#allocation7 + $0x1c0] ss:$8 sps:$4 sm:$0xff]  }
 0x412   :  { %2770 = vrcp.f32 %v1568_v26  ;;  %v1567_v49 = vadd.f32 2.0, %v1559_v46  ;;  %v2697_v48 = vld [vmem:[#allocation7 + $0x1d4] ss:$8 sps:$4 sm:$0xff]   ;;  %v2700_v44 = vld [vmem:[#allocation7 + $0x1e4] ss:$8 sps:$4 sm:$0xff]  }
 0x413   :  { %2772 = vrcp.f32 %v1563_v47  ;;  %v2698_v29 = vld [vmem:[#allocation7 + $0x1e0] ss:$8 sps:$4 sm:$0xff]   ;;  %v2701_v26 = vld [vmem:[#allocation7 + $0x1f0] ss:$8 sps:$4 sm:$0xff]  }
 0x414   :  { %2774 = vrcp.f32 %v1567_v49 }
 0x417   :  { %v2761_v51 = vpop.eup %2760 }
 0x418   :  { %v2763_v52 = vpop.eup %2762  ;;  %v1572_v39 = vmul.f32 %v2761_v51, %v1554_v36  ;;  %v2668_v36 = vld [vmem:[#allocation7 + $0x140] ss:$8 sps:$4 sm:$0xff]  }
 0x419   :  { %v2765_v25 = vpop.eup %2764  ;;  %v1570_v5 = vmul.f32 %v2763_v52, %v1553_v40  ;;  %v2674_v40 = vld [vmem:[#allocation7 + $0x160] ss:$8 sps:$4 sm:$0xff]  }
 0x41a   :  { %v2767_v18 = vpop.eup %2766  ;;  %v1580_v56 = vmul.f32 %v2765_v25, %v1558_v8  ;;  %v1586_v2 = vmul.f32 %v1572_v39, %v3205_v54  ;;  %v2677_v8 = vld [vmem:[#allocation7 + $0x170] ss:$8 sps:$4 sm:$0xff]  }
 0x41b   :  { %v2769_v58 = vpop.eup %2768  ;;  %v1578_v60 = vmul.f32 %v2767_v18, %v1557_v1  ;;  %v1585_v6 = vmul.f32 %v1570_v5, %v3207_v55  ;;  %v2683_v1 = vld [vmem:[#allocation7 + $0x190] ss:$8 sps:$4 sm:$0xff]  }
 0x41c   :  { %v2771_v0 = vpop.eup %2770  ;;  %v1590_v4 = vmul.f32 %v1580_v56, %v3213_v15  ;;  %v1576_v34 = vmul.f32 %v2769_v58, %v1556_v50  ;;  %v2694_v50 = vld [vmem:[#allocation7 + $0x1c4] ss:$8 sps:$4 sm:$0xff]  }
 0x41d   :  { %v2773_v35 = vpop.eup %2772  ;;  %v1589_v7 = vmul.f32 %v1578_v60, %v3216_v57  ;;  %v1584_v11 = vmul.f32 %v2771_v0, %v1560_v3  ;;  %v2659_v57 = vld [vmem:[#allocation7 + $0x110] ss:$8 sps:$4 sm:$0xff]  }
 0x41e   :  { %v2775_v13 = vpop.eup %2774  ;;  %v1594_v19 = vpack.c.bf16 %v1590_v4, %v1586_v2  ;;  %v1574_v21 = vmul.f32 %v2773_v35, %v1555_v45  ;;  %v1588_v23 = vmul.f32 %v1576_v34, %v3209_v9  ;;  %v2695_v3 = vld [vmem:[#allocation7 + $0x1d0] ss:$8 sps:$4 sm:$0xff]   ;;  %v2703_v45 = vld [vmem:[#allocation7 + $0x1f4] ss:$8 sps:$4 sm:$0xff]   ;;  %v2089_v35 = vld [vmem:[%s3277_s1] sm:$0xff] }
 0x41f   :  { %v1593_v22 = vpack.c.bf16 %v1589_v7, %v1585_v6  ;;  %v1592_v24 = vmul.f32 %v1584_v11, %v3219_v59  ;;  %v1582_v54 = vmul.f32 %v2775_v13, %v1559_v46  ;;  %v2662_v59 = vld [vmem:[#allocation7 + $0x120] ss:$8 sps:$4 sm:$0xff]  }
 0x420   :  { %2025 = vmatprep.mubr.bf16.mxu0 %v1594_v19  ;;  %v3236_v28 = vmul.f32 %v1574_v21, %v3211_v33  ;;  %v2670_v33 = vld [vmem:[#allocation7 + $0x144] ss:$8 sps:$4 sm:$0xff]   ;;  %v1661_v46 = vld [vmem:[%s3287_s11] sm:$0x3] }
 0x421   :  { %2026 = vmatmul.mubr.bf16.vlgmr.msra.gmra.mrb[8].mxu0 %v1593_v22  ;;  %v1596_v15 = vpack.c.bf16 %v1592_v24, %v1588_v23  ;;  %v3239_v55 = vmul.f32 %v1582_v54, %v3222_v62  ;;  %v2673_v62 = vld [vmem:[#allocation7 + $0x154] ss:$8 sps:$4 sm:$0xff]   ;;  %v1666_v47 = vrot.slane %v1661_v46, %v3015_v14  ;;  %v1670_v49 = vrot.slane %v1661_v46, %v3022_v17  ;;  %v2090_v11 = vld [vmem:[%s3277_s1 + $0x8] sm:$0xff]  ;;  %s2898_s1 = smov [#allocation8]  }
 0x422   :  { %2037 = vmatpush1.bf16.msra.mxu0 %v2656_v20  ;;  %v2099_v20 = vmul.f32 %v2089_v35, %v2089_v35  ;;  %v2100_v24 = vmul.f32 %v2090_v11, %v2090_v11  ;;  %s2154_s20 = sshll.u32 %s2898_s1, 4  ;;  %s2155_s20 = int_to_ptr.vmem [resolvable:$true] %s2154_s20 }
 0x423   :  { %2068 = vmatprep.mubr.bf16.mxu0 %v1596_v15  ;;  %2038 = vmatprep.subr.bf16.mxu0 %v2661_v27  ;;  %v1595_v9 = vpack.c.bf16 %v3239_v55, %v3236_v28  ;;  %s2862_s21 = scalar_lea.vmem %s2155_s20, 1024  ;;  %p2867_p11 = scmp.lt.s32.totalorder %s2155_s20, %s2155_s20 }
 0x424   :  { %p2863_p10 = scmp.ne.s32.totalorder %s2155_s20, %s2862_s21  ;;  %p2868_p12 = scmp.lt.s32.totalorder %s2862_s21, %s2862_s21 }
 0x426   :  { %2039 = vmatpush1.bf16.msra.mxu0 %v2659_v57  ;;  %p2869_p13 = por %p2868_p12, %p2867_p11 }
 0x427   :  { %2040 = vmatprep.subr.bf16.mxu0 %v2664_v30 }
 0x428   :  { %p2870_p0 = pnand %p2869_p13, %p2863_p10 }
 0x42a   :  { %2041 = vmatpush1.bf16.msra.mxu0 %v2662_v59 }
 0x42b   :  { %2042 = vmatprep.subr.bf16.mxu0 %v2667_v31 }
 0x42e   :  { %2043 = vmatpush1.bf16.msra.mxu0 %v2665_v32 }
 0x42f   :  { %2044 = vmatprep.subr.bf16.mxu0 %v2670_v33 }
 0x432   :  { %2045 = vmatpush1.bf16.msra.mxu0 %v2668_v36 }
 0x433   :  { %2046 = vmatprep.subr.bf16.mxu0 %v2673_v62 }
 0x436   :  { %2047 = vmatpush1.bf16.msra.mxu0 %v2671_v37 }
 0x437   :  { %2048 = vmatprep.subr.bf16.mxu0 %v2676_v38 }
 0x43a   :  { %2049 = vmatpush1.bf16.msra.mxu0 %v2674_v40 }
 0x43b   :  { %2050 = vmatprep.subr.bf16.mxu0 %v2679_v61 }
 0x43e   :  { %2051 = vmatpush1.bf16.msra.mxu0 %v2677_v8 }
 0x43f   :  { %2052 = vmatprep.subr.bf16.mxu0 %v2682_v41 }
 0x442   :  { %2053 = vmatpush1.bf16.msra.mxu0 %v2680_v63 }
 0x443   :  { %2054 = vmatprep.subr.bf16.mxu0 %v2685_v10 }
 0x446   :  { %2055 = vmatpush1.bf16.msra.mxu0 %v2683_v1 }
 0x447   :  { %2056 = vmatprep.subr.bf16.mxu0 %v2688_v12 }
 0x44a   :  { %2057 = vmatpush1.bf16.msra.mxu0 %v2686_v16 }
 0x44b   :  { %2058 = vmatprep.subr.bf16.mxu0 %v2691_v42 }
 0x44e   :  { %2059 = vmatpush1.bf16.msra.mxu0 %v2689_v43 }
 0x44f   :  { %2060 = vmatprep.subr.bf16.mxu0 %v2694_v50 }
 0x452   :  { %2061 = vmatpush1.bf16.msra.mxu0 %v2692_v53 }
 0x453   :  { %2062 = vmatprep.subr.bf16.mxu0 %v2697_v48 }
 0x456   :  { %2063 = vmatpush1.bf16.msra.mxu0 %v2695_v3 }
 0x457   :  { %2064 = vmatprep.subr.bf16.mxu0 %v2700_v44 }
 0x45a   :  { %2065 = vmatpush1.bf16.msra.mxu0 %v2698_v29 }
 0x45b   :  { %2066 = vmatprep.subr.bf16.mxu0 %v2703_v45 }
 0x45e   :  { %2067 = vmatpush1.bf16.msra.mxu0 %v2701_v26 }
 0x461   :  { %2069 = vmatmul.mubr.bf16.vlgmr.msra.gmra.mrb[8].mxu0 %v1595_v9 }
 0x534   :  { %v2070_v51 = vpop.f32.mrb[8].mxu0 }
 0x535   :  { %v2381_v52 = vadd.f32 %v2070_v51, %v1666_v47  ;;  %v2072_v39 = vpop.f32.mrb[9].mxu0 }
 0x536   :  { %v2382_v25 = vadd.f32 %v2072_v39, %v1670_v49  ;;  %v2074_v5 = vpop.f32.mrb[10].mxu0 }
 0x537   :  { %2776 = vtanh.f32 %v2381_v52  ;;  %v2383_v18 = vadd.f32 %v2074_v5, %v1666_v47  ;;  %v2076_v56 = vpop.f32.mrb[11].mxu0 }
 0x538   :  { %2778 = vtanh.f32 %v2382_v25  ;;  %v2384_v58 = vadd.f32 %v2076_v56, %v1670_v49 }
 0x539   :  { %2780 = vtanh.f32 %v2383_v18 }
 0x53a   :  { %2782 = vtanh.f32 %v2384_v58 }
 0x541   :  { %v2777_v60 = vpop.eup %2776 }
 0x542   :  { %v2779_v0 = vpop.eup %2778  ;;  %2140 = vst.msk [vmem:[#allocation8] sm:$0xff] %vm2109_vm1, %v2777_v60 }
 0x543   :  { %v2781_v14 = vpop.eup %2780  ;;  %v2081_v2 = vadd.f32 1.0, %v2779_v0 }
 0x544   :  { %v2783_v17 = vpop.eup %2782  ;;  %2141 = vst.msk [vmem:[#allocation8 + $0x20] sm:$0xff] %vm2109_vm1, %v2781_v14 }
 0x545   :  { %v2083_v4 = vmul.f32 0.5, %v2081_v2  ;;  %v2082_v34 = vadd.f32 1.0, %v2783_v17 }
 0x547   :  { %v2085_v6 = vmul.f32 7.0, %v2083_v4  ;;  %v2084_v7 = vmul.f32 0.5, %v2082_v34 }
 0x549   :  { %v2087_v13 = vadd.f32 -5.0, %v2085_v6  ;;  %v2086_v19 = vmul.f32 7.0, %v2084_v7 }
 0x54b   :  { %v2091_v21 = vmul.f32 1.442695, %v2087_v13  ;;  %2144 = vst.msk [vmem:[#allocation8 + $0x10] sm:$0xff] %vm2109_vm1, %v2087_v13  ;;  %v2088_v22 = vadd.f32 -5.0, %v2086_v19  ;;  %v2101_v23 = vmul.f32 2.0, %v2087_v13 }
 0x54d   :  { %2784 = vpow2.f32 %v2091_v21  ;;  %v2093_v27 = vmul.f32 1.442695, %v2088_v22  ;;  %2145 = vst.msk [vmem:[#allocation8 + $0x30] sm:$0xff] %vm2109_vm1, %v2088_v22  ;;  %v2103_v54 = vadd.f32 %v2101_v23, %v2099_v20  ;;  %v2102_v15 = vmul.f32 2.0, %v2088_v22 }
 0x54f   :  { %2786 = vpow2.f32 %v2093_v27  ;;  %v2105_v28 = vadd.f32 1.837877, %v2103_v54  ;;  %v2104_v55 = vadd.f32 %v2102_v15, %v2100_v24 }
 0x551   :  { %v2107_v57 = vmul.f32 -0.5, %v2105_v28  ;;  %v2106_v30 = vadd.f32 1.837877, %v2104_v55 }
 0x553   :  { %v2110_v9 = vsel %vm2109_vm1, %v2107_v57, 0.0  ;;  %v2108_v59 = vmul.f32 -0.5, %v2106_v30 }
 0x554   :  { %2111 = vadd.xlane.f32.xlu0 %v2110_v9 }
 0x555   :  { %v2113_v31 = vsel %vm2109_vm1, %v2108_v59, 0.0 }
 0x556   :  { %2114 = vadd.xlane.f32.xlu1 %v2113_v31 }
 0x557   :  { %v2785_v32 = vpop.eup %2784 }
 0x558   :  { %v2095_v33 = vmul.f32 %v2785_v32, %v2089_v35 }
 0x559   :  { %v2787_v36 = vpop.eup %2786 }
 0x55a   :  { %v2097_v62 = vadd.f32 %v2381_v52, %v2095_v33  ;;  %v2096_v37 = vmul.f32 %v2787_v36, %v2090_v11 }
 0x55c   :  { %2788 = vtanh.f32 %v2097_v62  ;;  %v2098_v38 = vadd.f32 %v2383_v18, %v2096_v37 }
 0x55e   :  { %2790 = vtanh.f32 %v2098_v38 }
 0x566   :  { %v2789_v40 = vpop.eup %2788 }
 0x567   :  { %2142 = vst.msk [vmem:[#allocation8 + $0x8] sm:$0xff] %vm2109_vm1, %v2789_v40  ;;  %v2120_v61 = vmul.f32 %v2789_v40, %v2789_v40 }
 0x568   :  { %v2791_v8 = vpop.eup %2790 }
 0x569   :  { %2143 = vst.msk [vmem:[#allocation8 + $0x28] sm:$0xff] %vm2109_vm1, %v2791_v8  ;;  %v2122_v41 = vsub.f32 1.0, %v2120_v61  ;;  %v2121_v63 = vmul.f32 %v2791_v8, %v2791_v8 }
 0x56b   :  { %v2124_v10 = vmax.f32 %v2122_v41, 0.0  ;;  %v2123_v1 = vsub.f32 1.0, %v2121_v63 }
 0x56d   :  { %v2126_v12 = vadd.f32 1e-06, %v2124_v10  ;;  %v2125_v16 = vmax.f32 %v2123_v1, 0.0 }
 0x56f   :  { %2792 = vlog2.f32 %v2126_v12  ;;  %v2127_v42 = vadd.f32 1e-06, %v2125_v16 }
 0x571   :  { %2794 = vlog2.f32 %v2127_v42 }
 0x579   :  { %v2793_v43 = vpop.eup %2792 }
 0x57a   :  { %v2129_v50 = vmul.f32 0.6931472, %v2793_v43 }
 0x57b   :  { %v2795_v53 = vpop.eup %2794 }
 0x57c   :  { %v2132_v48 = vsel %vm2109_vm1, %v2129_v50, 0.0  ;;  %v2131_v3 = vmul.f32 0.6931472, %v2795_v53 }
 0x57d   :  { %2133 = vadd.xlane.f32.xlu0 %v2132_v48 }
 0x57e   :  { %v2135_v44 = vsel %vm2109_vm1, %v2131_v3, 0.0 }
 0x57f   :  { %2136 = vadd.xlane.f32.xlu1 %v2135_v44 }
 0x5e1   :  { %v2112_v29 = vpop.xlane.xlu0 %2111 }
 0x5e3   :  { %v2115_v45 = vpop.xlane.xlu1 %2114 }
 0x60a   :  { %v2134_v26 = vpop.xlane.xlu0 %2133 }
 0x60b   :  { %v2138_v46 = vsub.f32 %v2112_v29, %v2134_v26 }
 0x60c   :  { %v2137_v47 = vpop.xlane.xlu1 %2136 }
 0x60d   :  { %2147 = vst.msk [vmem:[#allocation8 + $0x18] sm:$0xff] %vm2146_vm2, %v2138_v46  ;;  %v2139_v49 = vsub.f32 %v2115_v45, %v2137_v47 }
 0x60f   :  { %2148 = vst.msk [vmem:[#allocation8 + $0x38] sm:$0xff] %vm2146_vm2, %v2139_v49 }
 0x610   :  { %2873 = shalt.err (!%p2870_p0)
}
 0x611   :  { %s2874_s24 = scalar_lea.hbm %s3288_s12, 1024 }
 0x612   :  { %p2875_p1 = scmp.ne.s32.totalorder %s3288_s12, %s2874_s24  ;;  %p2878_p2 = scmp.lt.u32.totalorder %s2874_s24, %s3288_s12 }
 0x614   :  { %p2880_p3 = pnand %p2878_p2, %p2875_p1 }
 0x616   :  { %2883 = shalt.err (!%p2880_p3)
}
 0x617   :  { %s2899_s26 = smov 512   ;;  %s2900_s27 = smov 32  }
 0x618   :  { %2160 = dma.vmem_to_hbm [thread:$0]  %s2155_s20, 1024, %s3288_s12, [#allocation4], %s2899_s26, %s2899_s26, %s2900_s27  }
 0x619   :  { %2888 = dma.done.wait [#allocation4], 1024  }
 0x61a   :  { %2889 = vsyncadd [#allocation4], 4294966272 }
 0x61b   :  { %2164 = vsyncpa [#allocation3], 1 }
 0x61c   :  { %2165 = vsyncpa [#allocation6], 1 }
 0x61d   :  { %2166 = vsyncpa [#allocation4], 1 }

</bundles_post_ra>
